<compile_context>
chip_gen: v5e
topology: v5e:2x2
jax: 0.10.0
libtpu: 0.0.40
codegen_flags: <defaults>
</compile_context>

<pallas_src>
import functools

import jax
import jax.numpy as jnp
from jax.experimental import pallas as pl
from jax.experimental.pallas import tpu as pltpu

KSIZE = 7
PAD = (KSIZE - 1) // 2
BN_EPS = 1e-5
_ROW_CHUNK = 8          # one sublane tile of H per step of the fused sweeps


# --------------------------------------------------------------------------- #
# In-kernel helpers
# --------------------------------------------------------------------------- #
def _conv7x7_sigmoid(zmax, zmean, t_ref, bias):
    """sigmoid(conv7x7([max|mean]) + bias) via 2x7 banded-Toeplitz MXU matmuls.

    zmax, zmean : (A, B) f32 pooled maps (max / mean channel, kept separate so no
                  lane-offset concat / relayout is needed when B % 128 != 0).
    t_ref       : VMEM ref (2, KSIZE, B, B) bf16 Toeplitz weights with the BN scale
                  folded in ([0] = max channel, [1] = mean channel).
    bias        : scalar f32 (folded BN bias).
    Returns (A, B) float32 sigmoid gate.
    """
    A, B = zmax.shape
    zpad = jnp.zeros((PAD, B), jnp.bfloat16)
    zm = jnp.concatenate([zpad, zmax.astype(jnp.bfloat16), zpad], axis=0)   # (A+6, B)
    za = jnp.concatenate([zpad, zmean.astype(jnp.bfloat16), zpad], axis=0)  # (A+6, B)
    acc = jnp.zeros((A, B), jnp.float32)
    for ky in range(KSIZE):                         # ky = conv row tap (static)
        # NOTE: zm[ky:ky+A] is sublane-unaligned for ky != 0; acceptable because the
        # pooled maps are tiny relative to the block and the kernel is DMA-bound.
        acc = acc + jnp.dot(zm[ky:ky + A, :], t_ref[0, ky],
                            preferred_element_type=jnp.float32)
        acc = acc + jnp.dot(za[ky:ky + A, :], t_ref[1, ky],
                            preferred_element_type=jnp.float32)
    return jax.nn.sigmoid(acc + bias)


def _fused_triplet_kernel(bias_ref, x_ref, thw_ref, tcw_ref, thc_ref, o_ref,
                          *, no_spatial):
    """Fused TripletAttention for one batch element.

    bias_ref : SMEM (3,)   folded BN biases [hw, cw, hc]
    x_ref    : VMEM (C, H, W)
    t*_ref   : VMEM (2, 7, B, B) bf16 banded-Toeplitz conv weights per branch
    o_ref    : VMEM (C, H, W)
    """
    C, H, W = x_ref.shape
    f32 = jnp.float32

    # ---- Fused ZPool: ONE sweep over the block computes all six reductions
    #      (max + mean over C, over H and over W), chunked by sublane tiles of H.
    cw_mx = None
    cw_sm = None
    hw_mx_rows, hw_sm_rows = [], []
    hc_mx_cols, hc_sm_cols = [], []
    for h0 in range(0, H, _ROW_CHUNK):
        hh = min(_ROW_CHUNK, H - h0)
        tile = x_ref[:, h0:h0 + hh, :].astype(f32)           # (C, hh, W)
        # cw branch: pool over H  -> running (C, W) max / sum
        tmx = jnp.max(tile, axis=1)
        tsm = jnp.sum(tile, axis=1)
        cw_mx = tmx if cw_mx is None else jnp.maximum(cw_mx, tmx)
        cw_sm = tsm if cw_sm is None else cw_sm + tsm
        # hc branch: pool over W  -> (C, hh) column slab of the (C, H) map
        hc_mx_cols.append(jnp.max(tile, axis=2))
        hc_sm_cols.append(jnp.sum(tile, axis=2))
        if not no_spatial:
            # hw branch: pool over C -> (hh, W) row slab of the (H, W) map
            hw_mx_rows.append(jnp.max(tile, axis=0))
            hw_sm_rows.append(jnp.sum(tile, axis=0))

    m_cw_max = cw_mx
    m_cw_mean = cw_sm * (1.0 / H)
    m_hc_max = jnp.concatenate(hc_mx_cols, axis=1)            # (C, H)
    m_hc_mean = jnp.concatenate(hc_sm_cols, axis=1) * (1.0 / W)

    # ---- 7x7 conv (+ folded BN) + sigmoid per branch, on the MXU ----
    s_cw = _conv7x7_sigmoid(m_cw_max, m_cw_mean, tcw_ref, bias_ref[1])   # (C, W)
    s_hc = _conv7x7_sigmoid(m_hc_max, m_hc_mean, thc_ref, bias_ref[2])   # (C, H)
    if no_spatial:
        s_hw = None
        inv = 0.5
    else:
        m_hw_max = jnp.concatenate(hw_mx_rows, axis=0)                   # (H, W)
        m_hw_mean = jnp.concatenate(hw_sm_rows, axis=0) * (1.0 / C)
        s_hw = _conv7x7_sigmoid(m_hw_max, m_hw_mean, thw_ref, bias_ref[0])  # (H, W)
        inv = 1.0 / 3.0

    # ---- Apply: second (and last) sweep over x; chunked so the broadcast combined
    #      gate never materializes more than a (C, 8, W) f32 slab at a time.
    for h0 in range(0, H, _ROW_CHUNK):
        hh = min(_ROW_CHUNK, H - h0)
        sc = s_cw[:, None, :] + s_hc[:, h0:h0 + hh][:, :, None]
        if not no_spatial:
            sc = sc + s_hw[h0:h0 + hh][None, :, :]
        xc = x_ref[:, h0:h0 + hh, :].astype(f32)
        o_ref[:, h0:h0 + hh, :] = (xc * (inv * sc)).astype(o_ref.dtype)


# --------------------------------------------------------------------------- #
# Host-side weight preparation
# --------------------------------------------------------------------------- #
def _build_toeplitz(w_folded, B):
    """(2, 7, 7) folded conv taps -> (2, 7, B, B) bf16 banded-Toeplitz matrices.

    T[c, ky, bp, b] = w_folded[c, ky, bp - b + PAD] when |bp - b| <= PAD (else 0), so
    (pooled_rows @ T[c, ky])[a, b] = sum_kx w[c, ky, kx] * pooled[c, a, b + kx - PAD]
    with lane-boundary zero padding provided by the zero band of T.
    """
    bp = jnp.arange(B)[:, None]                 # contraction (input) column
    b = jnp.arange(B)[None, :]                  # output column
    kx = bp - b + PAD                           # (B, B)
    valid = (kx >= 0) & (kx < KSIZE)
    taps = w_folded[:, :, jnp.clip(kx, 0, KSIZE - 1)]          # (2, 7, B, B)
    taps = jnp.where(valid[None, None], taps, 0.0)
    return taps.astype(jnp.bfloat16)


def _vmem_limit_bytes():
    """~75% of per-core VMEM: ~96 MiB on v5e/v6e (128 MiB), ~48 MiB on v7x (64 MiB)."""
    try:
        cap = int(pltpu.get_tpu_info().vmem_capacity_bytes)
        return int(min(max((cap * 3) // 4, 32 * 1024 * 1024), 100 * 1024 * 1024))
    except Exception:
        return 48 * 1024 * 1024


def triplet_attention(x, params, no_spatial=False):
    """x: (N, C, H, W) NCHW (as in PyTorch). Returns TripletAttention(x)."""
    N, C, H, W = x.shape
    f32 = jnp.float32

    w_cw, g_cw, b_cw = params["cw"]
    w_hc, g_hc, b_hc = params["hc"]
    # cw branch convolves the (C, W) pooled map directly.
    t_cw = _build_toeplitz(w_cw.astype(f32) * g_cw, W)
    # hc branch: the kernel keeps its pooled map as (C, H) rather than the PyTorch
    # (H, C) layout, so the conv taps are spatially transposed.
    t_hc = _build_toeplitz(jnp.transpose(w_hc, (0, 2, 1)).astype(f32) * g_hc, H)
    if no_spatial:
        t_hw = jnp.zeros((2, KSIZE, W, W), jnp.bfloat16)
        biases = jnp.stack([jnp.zeros((), f32), b_cw.astype(f32), b_hc.astype(f32)])
    else:
        w_hw, g_hw, b_hw = params["hw"]
        t_hw = _build_toeplitz(w_hw.astype(f32) * g_hw, W)
        biases = jnp.stack([b_hw.astype(f32), b_cw.astype(f32), b_hc.astype(f32)])

    kernel = functools.partial(_fused_triplet_kernel, no_spatial=no_spatial)

    return pl.pallas_call(
        kernel,
        out_shape=jax.ShapeDtypeStruct((N, C, H, W), x.dtype),
        grid_spec=pltpu.PrefetchScalarGridSpec(
            num_scalar_prefetch=0,
            grid=(N,),
            in_specs=[
                pl.BlockSpec(memory_space=pltpu.MemorySpace.SMEM),        # biases (3,)
                pl.BlockSpec((None, C, H, W), lambda n: (n, 0, 0, 0)),    # x block
                pl.BlockSpec((2, KSIZE, W, W), lambda n: (0, 0, 0, 0)),   # t_hw
                pl.BlockSpec((2, KSIZE, W, W), lambda n: (0, 0, 0, 0)),   # t_cw
                pl.BlockSpec((2, KSIZE, H, H), lambda n: (0, 0, 0, 0)),   # t_hc
            ],
            out_specs=pl.BlockSpec((None, C, H, W), lambda n: (n, 0, 0, 0)),
        ),
        compiler_params=pltpu.CompilerParams(
            dimension_semantics=("parallel",),      # batch items are independent
            vmem_limit_bytes=_vmem_limit_bytes(),
        ),
    )(biases, x, t_hw, t_cw, t_hc)


# --------------------------------------------------------------------------- #
# Pure-JAX reference (mirrors the PyTorch module) for the correctness check
# --------------------------------------------------------------------------- #
def _gate_ref(x_pab, w, bn_scale, bn_bias):
    zmax = jnp.max(x_pab, axis=1, keepdims=True)
    zmean = jnp.mean(x_pab, axis=1, keepdims=True)
    z = jnp.concatenate([zmax, zmean], axis=1)             # (N, 2, A, B)
    y = jax.lax.conv_general_dilated(
        z, w[None],                                        # (1, 2, 7, 7)
        window_strides=(1, 1), padding=((PAD, PAD), (PAD, PAD)),
        dimension_numbers=("NCHW", "OIHW", "NCHW"),
        precision=jax.lax.Precision.HIGHEST)
    y = y * bn_scale + bn_bias
    return x_pab * jax.nn.sigmoid(y)


def _triplet_ref(x, params, no_spatial=False):
    x1 = jnp.transpose(x, (0, 2, 1, 3))
    y1 = jnp.transpose(_gate_ref(x1, *params["cw"]), (0, 2, 1, 3))
    x2 = jnp.transpose(x, (0, 3, 2, 1))
    y2 = jnp.transpose(_gate_ref(x2, *params["hc"]), (0, 3, 2, 1))
    if not no_spatial:
        y3 = _gate_ref(x, *params["hw"])
        return (1.0 / 3.0) * (y3 + y1 + y2)
    return 0.5 * (y1 + y2)


def _init_gate_params(key):
    kw, kg, kb = jax.random.split(key, 3)
    w = 0.1 * jax.random.normal(kw, (2, KSIZE, KSIZE), dtype=jnp.float32)
    gamma = 1.0 + 0.1 * jax.random.normal(kg, (), dtype=jnp.float32)
    beta = 0.1 * jax.random.normal(kb, (), dtype=jnp.float32)
    running_mean = jnp.float32(0.0)
    running_var = jnp.float32(1.0)
    bn_scale = gamma / jnp.sqrt(running_var + BN_EPS)      # inference-mode BN fold
    bn_bias = beta - running_mean * bn_scale
    return (w, bn_scale, bn_bias)


if __name__ == "__main__":
    key = jax.random.PRNGKey(0)
    kx, k1, k2, k3 = jax.random.split(key, 4)

    N, C, H, W = 2, 4, 16, 16
    x = jax.random.normal(kx, (N, C, H, W), dtype=jnp.float32)

    params = {
        "cw": _init_gate_params(k1),
        "hc": _init_gate_params(k2),
        "hw": _init_gate_params(k3),
    }

    fn = jax.jit(functools.partial(triplet_attention, no_spatial=False))
    out = jax.block_until_ready(fn(x, params))
    ref = jax.block_until_ready(_triplet_ref(x, params, no_spatial=False))

    assert out.shape == (N, C, H, W)
    # Tolerance accounts for single-pass bf16 MXU matmuls in the kernel's 7x7 conv
    # (the reference conv runs at Precision.HIGHEST); gates are sigmoid-compressed,
    # so observed error stays well below this bound.
    err = jnp.max(jnp.abs(out - ref))
    assert jnp.allclose(out, ref, rtol=2e-2, atol=2e-2), f"max abs diff {err}"

    print("KERNEL_OK")
</pallas_src>

<mosaic_0001>
module attributes {stable_mosaic.version = 11 : i64} {
  func.func @_fused_triplet_kernel(%arg0: i32, %arg1: memref<3xf32, #tpu.memory_space<smem>>, %arg2: memref<1x4x16x16xf32, #tpu.memory_space<vmem>>, %arg3: memref<2x7x16x16xbf16, #tpu.memory_space<vmem>>, %arg4: memref<2x7x16x16xbf16, #tpu.memory_space<vmem>>, %arg5: memref<2x7x16x16xbf16, #tpu.memory_space<vmem>>, %arg6: memref<1x4x16x16xf32, #tpu.memory_space<vmem>>) attributes {dimension_semantics = [#tpu.dimension_semantics<parallel>], iteration_bounds = array<i64: 2>, scalar_prefetch = 0 : i64, scratch_operands = 0 : i64, tpu.core_type = #tpu.core_type<tc>, window_params = [{transform_indices = @transform_0, window_bounds = array<i64: 3>}, {transform_indices = @transform_1, window_bounds = array<i64: 1, 4, 16, 16>}, {pipeline_mode = #tpu.pipeline_mode<synchronous>, transform_indices = @transform_2, window_bounds = array<i64: 2, 7, 16, 16>}, {pipeline_mode = #tpu.pipeline_mode<synchronous>, transform_indices = @transform_3, window_bounds = array<i64: 2, 7, 16, 16>}, {pipeline_mode = #tpu.pipeline_mode<synchronous>, transform_indices = @transform_4, window_bounds = array<i64: 2, 7, 16, 16>}, {transform_indices = @transform_5, window_bounds = array<i64: 1, 4, 16, 16>}]} {
    %c0 = arith.constant 0 : index
    %c0_0 = arith.constant 0 : index
    %c0_1 = arith.constant 0 : index
    %c0_2 = arith.constant 0 : index
    %0 = vector.load %arg2[%c0, %c0_0, %c0_1, %c0_2] : memref<1x4x16x16xf32, #tpu.memory_space<vmem>>, vector<1x4x8x16xf32>
    %1 = vector.shape_cast %0 : vector<1x4x8x16xf32> to vector<4x8x16xf32>
    %cst = arith.constant dense<0xFF800000> : vector<4x16xf32>
    %2 = vector.multi_reduction <maximumf>, %1, %cst [1] : vector<4x8x16xf32> to vector<4x16xf32>
    %cst_3 = arith.constant dense<0.000000e+00> : vector<4x16xf32>
    %3 = vector.multi_reduction <add>, %1, %cst_3 [1] : vector<4x8x16xf32> to vector<4x16xf32>
    %cst_4 = arith.constant dense<0xFF800000> : vector<4x8xf32>
    %4 = vector.multi_reduction <maximumf>, %1, %cst_4 [2] : vector<4x8x16xf32> to vector<4x8xf32>
    %cst_5 = arith.constant dense<0.000000e+00> : vector<4x8xf32>
    %5 = vector.multi_reduction <add>, %1, %cst_5 [2] : vector<4x8x16xf32> to vector<4x8xf32>
    %cst_6 = arith.constant dense<0xFF800000> : vector<8x16xf32>
    %6 = vector.multi_reduction <maximumf>, %1, %cst_6 [0] : vector<4x8x16xf32> to vector<8x16xf32>
    %cst_7 = arith.constant dense<0.000000e+00> : vector<8x16xf32>
    %7 = vector.multi_reduction <add>, %1, %cst_7 [0] : vector<4x8x16xf32> to vector<8x16xf32>
    %c0_8 = arith.constant 0 : index
    %c0_9 = arith.constant 0 : index
    %c8 = arith.constant 8 : index
    %c0_10 = arith.constant 0 : index
    %8 = vector.load %arg2[%c0_8, %c0_9, %c8, %c0_10] : memref<1x4x16x16xf32, #tpu.memory_space<vmem>>, vector<1x4x8x16xf32>
    %9 = vector.shape_cast %8 : vector<1x4x8x16xf32> to vector<4x8x16xf32>
    %cst_11 = arith.constant dense<0xFF800000> : vector<4x16xf32>
    %10 = vector.multi_reduction <maximumf>, %9, %cst_11 [1] : vector<4x8x16xf32> to vector<4x16xf32>
    %cst_12 = arith.constant dense<0.000000e+00> : vector<4x16xf32>
    %11 = vector.multi_reduction <add>, %9, %cst_12 [1] : vector<4x8x16xf32> to vector<4x16xf32>
    %12 = arith.maximumf %2, %10 : vector<4x16xf32>
    %13 = arith.addf %3, %11 : vector<4x16xf32>
    %cst_13 = arith.constant dense<0xFF800000> : vector<4x8xf32>
    %14 = vector.multi_reduction <maximumf>, %9, %cst_13 [2] : vector<4x8x16xf32> to vector<4x8xf32>
    %cst_14 = arith.constant dense<0.000000e+00> : vector<4x8xf32>
    %15 = vector.multi_reduction <add>, %9, %cst_14 [2] : vector<4x8x16xf32> to vector<4x8xf32>
    %cst_15 = arith.constant dense<0xFF800000> : vector<8x16xf32>
    %16 = vector.multi_reduction <maximumf>, %9, %cst_15 [0] : vector<4x8x16xf32> to vector<8x16xf32>
    %cst_16 = arith.constant dense<0.000000e+00> : vector<8x16xf32>
    %17 = vector.multi_reduction <add>, %9, %cst_16 [0] : vector<4x8x16xf32> to vector<8x16xf32>
    %cst_17 = arith.constant 6.250000e-02 : f32
    %18 = vector.broadcast %cst_17 : f32 to vector<4x16xf32>
    %19 = arith.mulf %13, %18 : vector<4x16xf32>
    %20 = tpu.concatenate %4, %14 in 1 : vector<4x8xf32>, vector<4x8xf32> -> vector<4x16xf32>
    %21 = tpu.concatenate %5, %15 in 1 : vector<4x8xf32>, vector<4x8xf32> -> vector<4x16xf32>
    %cst_18 = arith.constant 6.250000e-02 : f32
    %22 = vector.broadcast %cst_18 : f32 to vector<4x16xf32>
    %23 = arith.mulf %21, %22 : vector<4x16xf32>
    %c1 = arith.constant 1 : index
    %24 = memref.load %arg1[%c1] : memref<3xf32, #tpu.memory_space<smem>>
    %cst_19 = arith.constant 0.000000e+00 : bf16
    %25 = vector.broadcast %cst_19 : bf16 to vector<3x16xbf16>
    %26 = arith.truncf %12 : vector<4x16xf32> to vector<4x16xbf16>
    %27 = tpu.concatenate %25, %26, %25 in 0 : vector<3x16xbf16>, vector<4x16xbf16>, vector<3x16xbf16> -> vector<10x16xbf16>
    %28 = arith.truncf %19 : vector<4x16xf32> to vector<4x16xbf16>
    %29 = tpu.concatenate %25, %28, %25 in 0 : vector<3x16xbf16>, vector<4x16xbf16>, vector<3x16xbf16> -> vector<10x16xbf16>
    %cst_20 = arith.constant 0.000000e+00 : f32
    %30 = vector.broadcast %cst_20 : f32 to vector<4x16xf32>
    %31 = vector.extract_strided_slice %27 {offsets = [0, 0], sizes = [4, 16], strides = [1, 1]} : vector<10x16xbf16> to vector<4x16xbf16>
    %c0_21 = arith.constant 0 : index
    %c0_22 = arith.constant 0 : index
    %c0_23 = arith.constant 0 : index
    %c0_24 = arith.constant 0 : index
    %32 = vector.load %arg4[%c0_21, %c0_22, %c0_23, %c0_24] : memref<2x7x16x16xbf16, #tpu.memory_space<vmem>>, vector<1x1x16x16xbf16>
    %33 = vector.shape_cast %32 : vector<1x1x16x16xbf16> to vector<16x16xbf16>
    %cst_25 = arith.constant dense<0.000000e+00> : vector<4x16xf32>
    %34 = tpu.matmul %31, %33, %cst_25 {dimension_numbers = #tpu.dot_dimension_numbers<[1], [0], [0], [1], [0, 0, 1, 1], [], []>} : vector<4x16xbf16>, vector<16x16xbf16>, vector<4x16xf32> -> vector<4x16xf32>
    %35 = arith.addf %30, %34 : vector<4x16xf32>
    %36 = vector.extract_strided_slice %29 {offsets = [0, 0], sizes = [4, 16], strides = [1, 1]} : vector<10x16xbf16> to vector<4x16xbf16>
    %c1_26 = arith.constant 1 : index
    %c0_27 = arith.constant 0 : index
    %c0_28 = arith.constant 0 : index
    %c0_29 = arith.constant 0 : index
    %37 = vector.load %arg4[%c1_26, %c0_27, %c0_28, %c0_29] : memref<2x7x16x16xbf16, #tpu.memory_space<vmem>>, vector<1x1x16x16xbf16>
    %38 = vector.shape_cast %37 : vector<1x1x16x16xbf16> to vector<16x16xbf16>
    %cst_30 = arith.constant dense<0.000000e+00> : vector<4x16xf32>
    %39 = tpu.matmul %36, %38, %cst_30 {dimension_numbers = #tpu.dot_dimension_numbers<[1], [0], [0], [1], [0, 0, 1, 1], [], []>} : vector<4x16xbf16>, vector<16x16xbf16>, vector<4x16xf32> -> vector<4x16xf32>
    %40 = arith.addf %35, %39 : vector<4x16xf32>
    %41 = vector.extract_strided_slice %27 {offsets = [1, 0], sizes = [4, 16], strides = [1, 1]} : vector<10x16xbf16> to vector<4x16xbf16>
    %c0_31 = arith.constant 0 : index
    %c1_32 = arith.constant 1 : index
    %c0_33 = arith.constant 0 : index
    %c0_34 = arith.constant 0 : index
    %42 = vector.load %arg4[%c0_31, %c1_32, %c0_33, %c0_34] : memref<2x7x16x16xbf16, #tpu.memory_space<vmem>>, vector<1x1x16x16xbf16>
    %43 = vector.shape_cast %42 : vector<1x1x16x16xbf16> to vector<16x16xbf16>
    %cst_35 = arith.constant dense<0.000000e+00> : vector<4x16xf32>
    %44 = tpu.matmul %41, %43, %cst_35 {dimension_numbers = #tpu.dot_dimension_numbers<[1], [0], [0], [1], [0, 0, 1, 1], [], []>} : vector<4x16xbf16>, vector<16x16xbf16>, vector<4x16xf32> -> vector<4x16xf32>
    %45 = arith.addf %40, %44 : vector<4x16xf32>
    %46 = vector.extract_strided_slice %29 {offsets = [1, 0], sizes = [4, 16], strides = [1, 1]} : vector<10x16xbf16> to vector<4x16xbf16>
    %c1_36 = arith.constant 1 : index
    %c1_37 = arith.constant 1 : index
    %c0_38 = arith.constant 0 : index
    %c0_39 = arith.constant 0 : index
    %47 = vector.load %arg4[%c1_36, %c1_37, %c0_38, %c0_39] : memref<2x7x16x16xbf16, #tpu.memory_space<vmem>>, vector<1x1x16x16xbf16>
    %48 = vector.shape_cast %47 : vector<1x1x16x16xbf16> to vector<16x16xbf16>
    %cst_40 = arith.constant dense<0.000000e+00> : vector<4x16xf32>
    %49 = tpu.matmul %46, %48, %cst_40 {dimension_numbers = #tpu.dot_dimension_numbers<[1], [0], [0], [1], [0, 0, 1, 1], [], []>} : vector<4x16xbf16>, vector<16x16xbf16>, vector<4x16xf32> -> vector<4x16xf32>
    %50 = arith.addf %45, %49 : vector<4x16xf32>
    %51 = vector.extract_strided_slice %27 {offsets = [2, 0], sizes = [4, 16], strides = [1, 1]} : vector<10x16xbf16> to vector<4x16xbf16>
    %c0_41 = arith.constant 0 : index
    %c2 = arith.constant 2 : index
    %c0_42 = arith.constant 0 : index
    %c0_43 = arith.constant 0 : index
    %52 = vector.load %arg4[%c0_41, %c2, %c0_42, %c0_43] : memref<2x7x16x16xbf16, #tpu.memory_space<vmem>>, vector<1x1x16x16xbf16>
    %53 = vector.shape_cast %52 : vector<1x1x16x16xbf16> to vector<16x16xbf16>
    %cst_44 = arith.constant dense<0.000000e+00> : vector<4x16xf32>
    %54 = tpu.matmul %51, %53, %cst_44 {dimension_numbers = #tpu.dot_dimension_numbers<[1], [0], [0], [1], [0, 0, 1, 1], [], []>} : vector<4x16xbf16>, vector<16x16xbf16>, vector<4x16xf32> -> vector<4x16xf32>
    %55 = arith.addf %50, %54 : vector<4x16xf32>
    %56 = vector.extract_strided_slice %29 {offsets = [2, 0], sizes = [4, 16], strides = [1, 1]} : vector<10x16xbf16> to vector<4x16xbf16>
    %c1_45 = arith.constant 1 : index
    %c2_46 = arith.constant 2 : index
    %c0_47 = arith.constant 0 : index
    %c0_48 = arith.constant 0 : index
    %57 = vector.load %arg4[%c1_45, %c2_46, %c0_47, %c0_48] : memref<2x7x16x16xbf16, #tpu.memory_space<vmem>>, vector<1x1x16x16xbf16>
    %58 = vector.shape_cast %57 : vector<1x1x16x16xbf16> to vector<16x16xbf16>
    %cst_49 = arith.constant dense<0.000000e+00> : vector<4x16xf32>
    %59 = tpu.matmul %56, %58, %cst_49 {dimension_numbers = #tpu.dot_dimension_numbers<[1], [0], [0], [1], [0, 0, 1, 1], [], []>} : vector<4x16xbf16>, vector<16x16xbf16>, vector<4x16xf32> -> vector<4x16xf32>
    %60 = arith.addf %55, %59 : vector<4x16xf32>
    %61 = vector.extract_strided_slice %27 {offsets = [3, 0], sizes = [4, 16], strides = [1, 1]} : vector<10x16xbf16> to vector<4x16xbf16>
    %c0_50 = arith.constant 0 : index
    %c3 = arith.constant 3 : index
    %c0_51 = arith.constant 0 : index
    %c0_52 = arith.constant 0 : index
    %62 = vector.load %arg4[%c0_50, %c3, %c0_51, %c0_52] : memref<2x7x16x16xbf16, #tpu.memory_space<vmem>>, vector<1x1x16x16xbf16>
    %63 = vector.shape_cast %62 : vector<1x1x16x16xbf16> to vector<16x16xbf16>
    %cst_53 = arith.constant dense<0.000000e+00> : vector<4x16xf32>
    %64 = tpu.matmul %61, %63, %cst_53 {dimension_numbers = #tpu.dot_dimension_numbers<[1], [0], [0], [1], [0, 0, 1, 1], [], []>} : vector<4x16xbf16>, vector<16x16xbf16>, vector<4x16xf32> -> vector<4x16xf32>
    %65 = arith.addf %60, %64 : vector<4x16xf32>
    %66 = vector.extract_strided_slice %29 {offsets = [3, 0], sizes = [4, 16], strides = [1, 1]} : vector<10x16xbf16> to vector<4x16xbf16>
    %c1_54 = arith.constant 1 : index
    %c3_55 = arith.constant 3 : index
    %c0_56 = arith.constant 0 : index
    %c0_57 = arith.constant 0 : index
    %67 = vector.load %arg4[%c1_54, %c3_55, %c0_56, %c0_57] : memref<2x7x16x16xbf16, #tpu.memory_space<vmem>>, vector<1x1x16x16xbf16>
    %68 = vector.shape_cast %67 : vector<1x1x16x16xbf16> to vector<16x16xbf16>
    %cst_58 = arith.constant dense<0.000000e+00> : vector<4x16xf32>
    %69 = tpu.matmul %66, %68, %cst_58 {dimension_numbers = #tpu.dot_dimension_numbers<[1], [0], [0], [1], [0, 0, 1, 1], [], []>} : vector<4x16xbf16>, vector<16x16xbf16>, vector<4x16xf32> -> vector<4x16xf32>
    %70 = arith.addf %65, %69 : vector<4x16xf32>
    %71 = vector.extract_strided_slice %27 {offsets = [4, 0], sizes = [4, 16], strides = [1, 1]} : vector<10x16xbf16> to vector<4x16xbf16>
    %c0_59 = arith.constant 0 : index
    %c4 = arith.constant 4 : index
    %c0_60 = arith.constant 0 : index
    %c0_61 = arith.constant 0 : index
    %72 = vector.load %arg4[%c0_59, %c4, %c0_60, %c0_61] : memref<2x7x16x16xbf16, #tpu.memory_space<vmem>>, vector<1x1x16x16xbf16>
    %73 = vector.shape_cast %72 : vector<1x1x16x16xbf16> to vector<16x16xbf16>
    %cst_62 = arith.constant dense<0.000000e+00> : vector<4x16xf32>
    %74 = tpu.matmul %71, %73, %cst_62 {dimension_numbers = #tpu.dot_dimension_numbers<[1], [0], [0], [1], [0, 0, 1, 1], [], []>} : vector<4x16xbf16>, vector<16x16xbf16>, vector<4x16xf32> -> vector<4x16xf32>
    %75 = arith.addf %70, %74 : vector<4x16xf32>
    %76 = vector.extract_strided_slice %29 {offsets = [4, 0], sizes = [4, 16], strides = [1, 1]} : vector<10x16xbf16> to vector<4x16xbf16>
    %c1_63 = arith.constant 1 : index
    %c4_64 = arith.constant 4 : index
    %c0_65 = arith.constant 0 : index
    %c0_66 = arith.constant 0 : index
    %77 = vector.load %arg4[%c1_63, %c4_64, %c0_65, %c0_66] : memref<2x7x16x16xbf16, #tpu.memory_space<vmem>>, vector<1x1x16x16xbf16>
    %78 = vector.shape_cast %77 : vector<1x1x16x16xbf16> to vector<16x16xbf16>
    %cst_67 = arith.constant dense<0.000000e+00> : vector<4x16xf32>
    %79 = tpu.matmul %76, %78, %cst_67 {dimension_numbers = #tpu.dot_dimension_numbers<[1], [0], [0], [1], [0, 0, 1, 1], [], []>} : vector<4x16xbf16>, vector<16x16xbf16>, vector<4x16xf32> -> vector<4x16xf32>
    %80 = arith.addf %75, %79 : vector<4x16xf32>
    %81 = vector.extract_strided_slice %27 {offsets = [5, 0], sizes = [4, 16], strides = [1, 1]} : vector<10x16xbf16> to vector<4x16xbf16>
    %c0_68 = arith.constant 0 : index
    %c5 = arith.constant 5 : index
    %c0_69 = arith.constant 0 : index
    %c0_70 = arith.constant 0 : index
    %82 = vector.load %arg4[%c0_68, %c5, %c0_69, %c0_70] : memref<2x7x16x16xbf16, #tpu.memory_space<vmem>>, vector<1x1x16x16xbf16>
    %83 = vector.shape_cast %82 : vector<1x1x16x16xbf16> to vector<16x16xbf16>
    %cst_71 = arith.constant dense<0.000000e+00> : vector<4x16xf32>
    %84 = tpu.matmul %81, %83, %cst_71 {dimension_numbers = #tpu.dot_dimension_numbers<[1], [0], [0], [1], [0, 0, 1, 1], [], []>} : vector<4x16xbf16>, vector<16x16xbf16>, vector<4x16xf32> -> vector<4x16xf32>
    %85 = arith.addf %80, %84 : vector<4x16xf32>
    %86 = vector.extract_strided_slice %29 {offsets = [5, 0], sizes = [4, 16], strides = [1, 1]} : vector<10x16xbf16> to vector<4x16xbf16>
    %c1_72 = arith.constant 1 : index
    %c5_73 = arith.constant 5 : index
    %c0_74 = arith.constant 0 : index
    %c0_75 = arith.constant 0 : index
    %87 = vector.load %arg4[%c1_72, %c5_73, %c0_74, %c0_75] : memref<2x7x16x16xbf16, #tpu.memory_space<vmem>>, vector<1x1x16x16xbf16>
    %88 = vector.shape_cast %87 : vector<1x1x16x16xbf16> to vector<16x16xbf16>
    %cst_76 = arith.constant dense<0.000000e+00> : vector<4x16xf32>
    %89 = tpu.matmul %86, %88, %cst_76 {dimension_numbers = #tpu.dot_dimension_numbers<[1], [0], [0], [1], [0, 0, 1, 1], [], []>} : vector<4x16xbf16>, vector<16x16xbf16>, vector<4x16xf32> -> vector<4x16xf32>
    %90 = arith.addf %85, %89 : vector<4x16xf32>
    %91 = vector.extract_strided_slice %27 {offsets = [6, 0], sizes = [4, 16], strides = [1, 1]} : vector<10x16xbf16> to vector<4x16xbf16>
    %c0_77 = arith.constant 0 : index
    %c6 = arith.constant 6 : index
    %c0_78 = arith.constant 0 : index
    %c0_79 = arith.constant 0 : index
    %92 = vector.load %arg4[%c0_77, %c6, %c0_78, %c0_79] : memref<2x7x16x16xbf16, #tpu.memory_space<vmem>>, vector<1x1x16x16xbf16>
    %93 = vector.shape_cast %92 : vector<1x1x16x16xbf16> to vector<16x16xbf16>
    %cst_80 = arith.constant dense<0.000000e+00> : vector<4x16xf32>
    %94 = tpu.matmul %91, %93, %cst_80 {dimension_numbers = #tpu.dot_dimension_numbers<[1], [0], [0], [1], [0, 0, 1, 1], [], []>} : vector<4x16xbf16>, vector<16x16xbf16>, vector<4x16xf32> -> vector<4x16xf32>
    %95 = arith.addf %90, %94 : vector<4x16xf32>
    %96 = vector.extract_strided_slice %29 {offsets = [6, 0], sizes = [4, 16], strides = [1, 1]} : vector<10x16xbf16> to vector<4x16xbf16>
    %c1_81 = arith.constant 1 : index
    %c6_82 = arith.constant 6 : index
    %c0_83 = arith.constant 0 : index
    %c0_84 = arith.constant 0 : index
    %97 = vector.load %arg4[%c1_81, %c6_82, %c0_83, %c0_84] : memref<2x7x16x16xbf16, #tpu.memory_space<vmem>>, vector<1x1x16x16xbf16>
    %98 = vector.shape_cast %97 : vector<1x1x16x16xbf16> to vector<16x16xbf16>
    %cst_85 = arith.constant dense<0.000000e+00> : vector<4x16xf32>
    %99 = tpu.matmul %96, %98, %cst_85 {dimension_numbers = #tpu.dot_dimension_numbers<[1], [0], [0], [1], [0, 0, 1, 1], [], []>} : vector<4x16xbf16>, vector<16x16xbf16>, vector<4x16xf32> -> vector<4x16xf32>
    %100 = arith.addf %95, %99 : vector<4x16xf32>
    %101 = vector.broadcast %24 : f32 to vector<4x16xf32>
    %102 = arith.addf %100, %101 : vector<4x16xf32>
    %103 = arith.negf %102 : vector<4x16xf32>
    %104 = math.exp %103 : vector<4x16xf32>
    %cst_86 = arith.constant 1.000000e+00 : f32
    %105 = vector.broadcast %cst_86 : f32 to vector<4x16xf32>
    %106 = arith.addf %105, %104 : vector<4x16xf32>
    %107 = arith.divf %105, %106 : vector<4x16xf32>
    %c2_87 = arith.constant 2 : index
    %108 = memref.load %arg1[%c2_87] : memref<3xf32, #tpu.memory_space<smem>>
    %cst_88 = arith.constant 0.000000e+00 : bf16
    %109 = vector.broadcast %cst_88 : bf16 to vector<3x16xbf16>
    %110 = arith.truncf %20 : vector<4x16xf32> to vector<4x16xbf16>
    %111 = tpu.concatenate %109, %110, %109 in 0 : vector<3x16xbf16>, vector<4x16xbf16>, vector<3x16xbf16> -> vector<10x16xbf16>
    %112 = arith.truncf %23 : vector<4x16xf32> to vector<4x16xbf16>
    %113 = tpu.concatenate %109, %112, %109 in 0 : vector<3x16xbf16>, vector<4x16xbf16>, vector<3x16xbf16> -> vector<10x16xbf16>
    %cst_89 = arith.constant 0.000000e+00 : f32
    %114 = vector.broadcast %cst_89 : f32 to vector<4x16xf32>
    %115 = vector.extract_strided_slice %111 {offsets = [0, 0], sizes = [4, 16], strides = [1, 1]} : vector<10x16xbf16> to vector<4x16xbf16>
    %c0_90 = arith.constant 0 : index
    %c0_91 = arith.constant 0 : index
    %c0_92 = arith.constant 0 : index
    %c0_93 = arith.constant 0 : index
    %116 = vector.load %arg5[%c0_90, %c0_91, %c0_92, %c0_93] : memref<2x7x16x16xbf16, #tpu.memory_space<vmem>>, vector<1x1x16x16xbf16>
    %117 = vector.shape_cast %116 : vector<1x1x16x16xbf16> to vector<16x16xbf16>
    %cst_94 = arith.constant dense<0.000000e+00> : vector<4x16xf32>
    %118 = tpu.matmul %115, %117, %cst_94 {dimension_numbers = #tpu.dot_dimension_numbers<[1], [0], [0], [1], [0, 0, 1, 1], [], []>} : vector<4x16xbf16>, vector<16x16xbf16>, vector<4x16xf32> -> vector<4x16xf32>
    %119 = arith.addf %114, %118 : vector<4x16xf32>
    %120 = vector.extract_strided_slice %113 {offsets = [0, 0], sizes = [4, 16], strides = [1, 1]} : vector<10x16xbf16> to vector<4x16xbf16>
    %c1_95 = arith.constant 1 : index
    %c0_96 = arith.constant 0 : index
    %c0_97 = arith.constant 0 : index
    %c0_98 = arith.constant 0 : index
    %121 = vector.load %arg5[%c1_95, %c0_96, %c0_97, %c0_98] : memref<2x7x16x16xbf16, #tpu.memory_space<vmem>>, vector<1x1x16x16xbf16>
    %122 = vector.shape_cast %121 : vector<1x1x16x16xbf16> to vector<16x16xbf16>
    %cst_99 = arith.constant dense<0.000000e+00> : vector<4x16xf32>
    %123 = tpu.matmul %120, %122, %cst_99 {dimension_numbers = #tpu.dot_dimension_numbers<[1], [0], [0], [1], [0, 0, 1, 1], [], []>} : vector<4x16xbf16>, vector<16x16xbf16>, vector<4x16xf32> -> vector<4x16xf32>
    %124 = arith.addf %119, %123 : vector<4x16xf32>
    %125 = vector.extract_strided_slice %111 {offsets = [1, 0], sizes = [4, 16], strides = [1, 1]} : vector<10x16xbf16> to vector<4x16xbf16>
    %c0_100 = arith.constant 0 : index
    %c1_101 = arith.constant 1 : index
    %c0_102 = arith.constant 0 : index
    %c0_103 = arith.constant 0 : index
    %126 = vector.load %arg5[%c0_100, %c1_101, %c0_102, %c0_103] : memref<2x7x16x16xbf16, #tpu.memory_space<vmem>>, vector<1x1x16x16xbf16>
    %127 = vector.shape_cast %126 : vector<1x1x16x16xbf16> to vector<16x16xbf16>
    %cst_104 = arith.constant dense<0.000000e+00> : vector<4x16xf32>
    %128 = tpu.matmul %125, %127, %cst_104 {dimension_numbers = #tpu.dot_dimension_numbers<[1], [0], [0], [1], [0, 0, 1, 1], [], []>} : vector<4x16xbf16>, vector<16x16xbf16>, vector<4x16xf32> -> vector<4x16xf32>
    %129 = arith.addf %124, %128 : vector<4x16xf32>
    %130 = vector.extract_strided_slice %113 {offsets = [1, 0], sizes = [4, 16], strides = [1, 1]} : vector<10x16xbf16> to vector<4x16xbf16>
    %c1_105 = arith.constant 1 : index
    %c1_106 = arith.constant 1 : index
    %c0_107 = arith.constant 0 : index
    %c0_108 = arith.constant 0 : index
    %131 = vector.load %arg5[%c1_105, %c1_106, %c0_107, %c0_108] : memref<2x7x16x16xbf16, #tpu.memory_space<vmem>>, vector<1x1x16x16xbf16>
    %132 = vector.shape_cast %131 : vector<1x1x16x16xbf16> to vector<16x16xbf16>
    %cst_109 = arith.constant dense<0.000000e+00> : vector<4x16xf32>
    %133 = tpu.matmul %130, %132, %cst_109 {dimension_numbers = #tpu.dot_dimension_numbers<[1], [0], [0], [1], [0, 0, 1, 1], [], []>} : vector<4x16xbf16>, vector<16x16xbf16>, vector<4x16xf32> -> vector<4x16xf32>
    %134 = arith.addf %129, %133 : vector<4x16xf32>
    %135 = vector.extract_strided_slice %111 {offsets = [2, 0], sizes = [4, 16], strides = [1, 1]} : vector<10x16xbf16> to vector<4x16xbf16>
    %c0_110 = arith.constant 0 : index
    %c2_111 = arith.constant 2 : index
    %c0_112 = arith.constant 0 : index
    %c0_113 = arith.constant 0 : index
    %136 = vector.load %arg5[%c0_110, %c2_111, %c0_112, %c0_113] : memref<2x7x16x16xbf16, #tpu.memory_space<vmem>>, vector<1x1x16x16xbf16>
    %137 = vector.shape_cast %136 : vector<1x1x16x16xbf16> to vector<16x16xbf16>
    %cst_114 = arith.constant dense<0.000000e+00> : vector<4x16xf32>
    %138 = tpu.matmul %135, %137, %cst_114 {dimension_numbers = #tpu.dot_dimension_numbers<[1], [0], [0], [1], [0, 0, 1, 1], [], []>} : vector<4x16xbf16>, vector<16x16xbf16>, vector<4x16xf32> -> vector<4x16xf32>
    %139 = arith.addf %134, %138 : vector<4x16xf32>
    %140 = vector.extract_strided_slice %113 {offsets = [2, 0], sizes = [4, 16], strides = [1, 1]} : vector<10x16xbf16> to vector<4x16xbf16>
    %c1_115 = arith.constant 1 : index
    %c2_116 = arith.constant 2 : index
    %c0_117 = arith.constant 0 : index
    %c0_118 = arith.constant 0 : index
    %141 = vector.load %arg5[%c1_115, %c2_116, %c0_117, %c0_118] : memref<2x7x16x16xbf16, #tpu.memory_space<vmem>>, vector<1x1x16x16xbf16>
    %142 = vector.shape_cast %141 : vector<1x1x16x16xbf16> to vector<16x16xbf16>
    %cst_119 = arith.constant dense<0.000000e+00> : vector<4x16xf32>
    %143 = tpu.matmul %140, %142, %cst_119 {dimension_numbers = #tpu.dot_dimension_numbers<[1], [0], [0], [1], [0, 0, 1, 1], [], []>} : vector<4x16xbf16>, vector<16x16xbf16>, vector<4x16xf32> -> vector<4x16xf32>
    %144 = arith.addf %139, %143 : vector<4x16xf32>
    %145 = vector.extract_strided_slice %111 {offsets = [3, 0], sizes = [4, 16], strides = [1, 1]} : vector<10x16xbf16> to vector<4x16xbf16>
    %c0_120 = arith.constant 0 : index
    %c3_121 = arith.constant 3 : index
    %c0_122 = arith.constant 0 : index
    %c0_123 = arith.constant 0 : index
    %146 = vector.load %arg5[%c0_120, %c3_121, %c0_122, %c0_123] : memref<2x7x16x16xbf16, #tpu.memory_space<vmem>>, vector<1x1x16x16xbf16>
    %147 = vector.shape_cast %146 : vector<1x1x16x16xbf16> to vector<16x16xbf16>
    %cst_124 = arith.constant dense<0.000000e+00> : vector<4x16xf32>
    %148 = tpu.matmul %145, %147, %cst_124 {dimension_numbers = #tpu.dot_dimension_numbers<[1], [0], [0], [1], [0, 0, 1, 1], [], []>} : vector<4x16xbf16>, vector<16x16xbf16>, vector<4x16xf32> -> vector<4x16xf32>
    %149 = arith.addf %144, %148 : vector<4x16xf32>
    %150 = vector.extract_strided_slice %113 {offsets = [3, 0], sizes = [4, 16], strides = [1, 1]} : vector<10x16xbf16> to vector<4x16xbf16>
    %c1_125 = arith.constant 1 : index
    %c3_126 = arith.constant 3 : index
    %c0_127 = arith.constant 0 : index
    %c0_128 = arith.constant 0 : index
    %151 = vector.load %arg5[%c1_125, %c3_126, %c0_127, %c0_128] : memref<2x7x16x16xbf16, #tpu.memory_space<vmem>>, vector<1x1x16x16xbf16>
    %152 = vector.shape_cast %151 : vector<1x1x16x16xbf16> to vector<16x16xbf16>
    %cst_129 = arith.constant dense<0.000000e+00> : vector<4x16xf32>
    %153 = tpu.matmul %150, %152, %cst_129 {dimension_numbers = #tpu.dot_dimension_numbers<[1], [0], [0], [1], [0, 0, 1, 1], [], []>} : vector<4x16xbf16>, vector<16x16xbf16>, vector<4x16xf32> -> vector<4x16xf32>
    %154 = arith.addf %149, %153 : vector<4x16xf32>
    %155 = vector.extract_strided_slice %111 {offsets = [4, 0], sizes = [4, 16], strides = [1, 1]} : vector<10x16xbf16> to vector<4x16xbf16>
    %c0_130 = arith.constant 0 : index
    %c4_131 = arith.constant 4 : index
    %c0_132 = arith.constant 0 : index
    %c0_133 = arith.constant 0 : index
    %156 = vector.load %arg5[%c0_130, %c4_131, %c0_132, %c0_133] : memref<2x7x16x16xbf16, #tpu.memory_space<vmem>>, vector<1x1x16x16xbf16>
    %157 = vector.shape_cast %156 : vector<1x1x16x16xbf16> to vector<16x16xbf16>
    %cst_134 = arith.constant dense<0.000000e+00> : vector<4x16xf32>
    %158 = tpu.matmul %155, %157, %cst_134 {dimension_numbers = #tpu.dot_dimension_numbers<[1], [0], [0], [1], [0, 0, 1, 1], [], []>} : vector<4x16xbf16>, vector<16x16xbf16>, vector<4x16xf32> -> vector<4x16xf32>
    %159 = arith.addf %154, %158 : vector<4x16xf32>
    %160 = vector.extract_strided_slice %113 {offsets = [4, 0], sizes = [4, 16], strides = [1, 1]} : vector<10x16xbf16> to vector<4x16xbf16>
    %c1_135 = arith.constant 1 : index
    %c4_136 = arith.constant 4 : index
    %c0_137 = arith.constant 0 : index
    %c0_138 = arith.constant 0 : index
    %161 = vector.load %arg5[%c1_135, %c4_136, %c0_137, %c0_138] : memref<2x7x16x16xbf16, #tpu.memory_space<vmem>>, vector<1x1x16x16xbf16>
    %162 = vector.shape_cast %161 : vector<1x1x16x16xbf16> to vector<16x16xbf16>
    %cst_139 = arith.constant dense<0.000000e+00> : vector<4x16xf32>
    %163 = tpu.matmul %160, %162, %cst_139 {dimension_numbers = #tpu.dot_dimension_numbers<[1], [0], [0], [1], [0, 0, 1, 1], [], []>} : vector<4x16xbf16>, vector<16x16xbf16>, vector<4x16xf32> -> vector<4x16xf32>
    %164 = arith.addf %159, %163 : vector<4x16xf32>
    %165 = vector.extract_strided_slice %111 {offsets = [5, 0], sizes = [4, 16], strides = [1, 1]} : vector<10x16xbf16> to vector<4x16xbf16>
    %c0_140 = arith.constant 0 : index
    %c5_141 = arith.constant 5 : index
    %c0_142 = arith.constant 0 : index
    %c0_143 = arith.constant 0 : index
    %166 = vector.load %arg5[%c0_140, %c5_141, %c0_142, %c0_143] : memref<2x7x16x16xbf16, #tpu.memory_space<vmem>>, vector<1x1x16x16xbf16>
    %167 = vector.shape_cast %166 : vector<1x1x16x16xbf16> to vector<16x16xbf16>
    %cst_144 = arith.constant dense<0.000000e+00> : vector<4x16xf32>
    %168 = tpu.matmul %165, %167, %cst_144 {dimension_numbers = #tpu.dot_dimension_numbers<[1], [0], [0], [1], [0, 0, 1, 1], [], []>} : vector<4x16xbf16>, vector<16x16xbf16>, vector<4x16xf32> -> vector<4x16xf32>
    %169 = arith.addf %164, %168 : vector<4x16xf32>
    %170 = vector.extract_strided_slice %113 {offsets = [5, 0], sizes = [4, 16], strides = [1, 1]} : vector<10x16xbf16> to vector<4x16xbf16>
    %c1_145 = arith.constant 1 : index
    %c5_146 = arith.constant 5 : index
    %c0_147 = arith.constant 0 : index
    %c0_148 = arith.constant 0 : index
    %171 = vector.load %arg5[%c1_145, %c5_146, %c0_147, %c0_148] : memref<2x7x16x16xbf16, #tpu.memory_space<vmem>>, vector<1x1x16x16xbf16>
    %172 = vector.shape_cast %171 : vector<1x1x16x16xbf16> to vector<16x16xbf16>
    %cst_149 = arith.constant dense<0.000000e+00> : vector<4x16xf32>
    %173 = tpu.matmul %170, %172, %cst_149 {dimension_numbers = #tpu.dot_dimension_numbers<[1], [0], [0], [1], [0, 0, 1, 1], [], []>} : vector<4x16xbf16>, vector<16x16xbf16>, vector<4x16xf32> -> vector<4x16xf32>
    %174 = arith.addf %169, %173 : vector<4x16xf32>
    %175 = vector.extract_strided_slice %111 {offsets = [6, 0], sizes = [4, 16], strides = [1, 1]} : vector<10x16xbf16> to vector<4x16xbf16>
    %c0_150 = arith.constant 0 : index
    %c6_151 = arith.constant 6 : index
    %c0_152 = arith.constant 0 : index
    %c0_153 = arith.constant 0 : index
    %176 = vector.load %arg5[%c0_150, %c6_151, %c0_152, %c0_153] : memref<2x7x16x16xbf16, #tpu.memory_space<vmem>>, vector<1x1x16x16xbf16>
    %177 = vector.shape_cast %176 : vector<1x1x16x16xbf16> to vector<16x16xbf16>
    %cst_154 = arith.constant dense<0.000000e+00> : vector<4x16xf32>
    %178 = tpu.matmul %175, %177, %cst_154 {dimension_numbers = #tpu.dot_dimension_numbers<[1], [0], [0], [1], [0, 0, 1, 1], [], []>} : vector<4x16xbf16>, vector<16x16xbf16>, vector<4x16xf32> -> vector<4x16xf32>
    %179 = arith.addf %174, %178 : vector<4x16xf32>
    %180 = vector.extract_strided_slice %113 {offsets = [6, 0], sizes = [4, 16], strides = [1, 1]} : vector<10x16xbf16> to vector<4x16xbf16>
    %c1_155 = arith.constant 1 : index
    %c6_156 = arith.constant 6 : index
    %c0_157 = arith.constant 0 : index
    %c0_158 = arith.constant 0 : index
    %181 = vector.load %arg5[%c1_155, %c6_156, %c0_157, %c0_158] : memref<2x7x16x16xbf16, #tpu.memory_space<vmem>>, vector<1x1x16x16xbf16>
    %182 = vector.shape_cast %181 : vector<1x1x16x16xbf16> to vector<16x16xbf16>
    %cst_159 = arith.constant dense<0.000000e+00> : vector<4x16xf32>
    %183 = tpu.matmul %180, %182, %cst_159 {dimension_numbers = #tpu.dot_dimension_numbers<[1], [0], [0], [1], [0, 0, 1, 1], [], []>} : vector<4x16xbf16>, vector<16x16xbf16>, vector<4x16xf32> -> vector<4x16xf32>
    %184 = arith.addf %179, %183 : vector<4x16xf32>
    %185 = vector.broadcast %108 : f32 to vector<4x16xf32>
    %186 = arith.addf %184, %185 : vector<4x16xf32>
    %187 = arith.negf %186 : vector<4x16xf32>
    %188 = math.exp %187 : vector<4x16xf32>
    %cst_160 = arith.constant 1.000000e+00 : f32
    %189 = vector.broadcast %cst_160 : f32 to vector<4x16xf32>
    %190 = arith.addf %189, %188 : vector<4x16xf32>
    %191 = arith.divf %189, %190 : vector<4x16xf32>
    %192 = tpu.concatenate %6, %16 in 0 : vector<8x16xf32>, vector<8x16xf32> -> vector<16x16xf32>
    %193 = tpu.concatenate %7, %17 in 0 : vector<8x16xf32>, vector<8x16xf32> -> vector<16x16xf32>
    %cst_161 = arith.constant 2.500000e-01 : f32
    %194 = vector.broadcast %cst_161 : f32 to vector<16x16xf32>
    %195 = arith.mulf %193, %194 : vector<16x16xf32>
    %c0_162 = arith.constant 0 : index
    %196 = memref.load %arg1[%c0_162] : memref<3xf32, #tpu.memory_space<smem>>
    %cst_163 = arith.constant 0.000000e+00 : bf16
    %197 = vector.broadcast %cst_163 : bf16 to vector<3x16xbf16>
    %198 = arith.truncf %192 : vector<16x16xf32> to vector<16x16xbf16>
    %199 = tpu.concatenate %197, %198, %197 in 0 : vector<3x16xbf16>, vector<16x16xbf16>, vector<3x16xbf16> -> vector<22x16xbf16>
    %200 = arith.truncf %195 : vector<16x16xf32> to vector<16x16xbf16>
    %201 = tpu.concatenate %197, %200, %197 in 0 : vector<3x16xbf16>, vector<16x16xbf16>, vector<3x16xbf16> -> vector<22x16xbf16>
    %cst_164 = arith.constant 0.000000e+00 : f32
    %202 = vector.broadcast %cst_164 : f32 to vector<16x16xf32>
    %203 = vector.extract_strided_slice %199 {offsets = [0, 0], sizes = [16, 16], strides = [1, 1]} : vector<22x16xbf16> to vector<16x16xbf16>
    %c0_165 = arith.constant 0 : index
    %c0_166 = arith.constant 0 : index
    %c0_167 = arith.constant 0 : index
    %c0_168 = arith.constant 0 : index
    %204 = vector.load %arg3[%c0_165, %c0_166, %c0_167, %c0_168] : memref<2x7x16x16xbf16, #tpu.memory_space<vmem>>, vector<1x1x16x16xbf16>
    %205 = vector.shape_cast %204 : vector<1x1x16x16xbf16> to vector<16x16xbf16>
    %cst_169 = arith.constant dense<0.000000e+00> : vector<16x16xf32>
    %206 = tpu.matmul %203, %205, %cst_169 {dimension_numbers = #tpu.dot_dimension_numbers<[1], [0], [0], [1], [0, 0, 1, 1], [], []>} : vector<16x16xbf16>, vector<16x16xbf16>, vector<16x16xf32> -> vector<16x16xf32>
    %207 = arith.addf %202, %206 : vector<16x16xf32>
    %208 = vector.extract_strided_slice %201 {offsets = [0, 0], sizes = [16, 16], strides = [1, 1]} : vector<22x16xbf16> to vector<16x16xbf16>
    %c1_170 = arith.constant 1 : index
    %c0_171 = arith.constant 0 : index
    %c0_172 = arith.constant 0 : index
    %c0_173 = arith.constant 0 : index
    %209 = vector.load %arg3[%c1_170, %c0_171, %c0_172, %c0_173] : memref<2x7x16x16xbf16, #tpu.memory_space<vmem>>, vector<1x1x16x16xbf16>
    %210 = vector.shape_cast %209 : vector<1x1x16x16xbf16> to vector<16x16xbf16>
    %cst_174 = arith.constant dense<0.000000e+00> : vector<16x16xf32>
    %211 = tpu.matmul %208, %210, %cst_174 {dimension_numbers = #tpu.dot_dimension_numbers<[1], [0], [0], [1], [0, 0, 1, 1], [], []>} : vector<16x16xbf16>, vector<16x16xbf16>, vector<16x16xf32> -> vector<16x16xf32>
    %212 = arith.addf %207, %211 : vector<16x16xf32>
    %213 = vector.extract_strided_slice %199 {offsets = [1, 0], sizes = [16, 16], strides = [1, 1]} : vector<22x16xbf16> to vector<16x16xbf16>
    %c0_175 = arith.constant 0 : index
    %c1_176 = arith.constant 1 : index
    %c0_177 = arith.constant 0 : index
    %c0_178 = arith.constant 0 : index
    %214 = vector.load %arg3[%c0_175, %c1_176, %c0_177, %c0_178] : memref<2x7x16x16xbf16, #tpu.memory_space<vmem>>, vector<1x1x16x16xbf16>
    %215 = vector.shape_cast %214 : vector<1x1x16x16xbf16> to vector<16x16xbf16>
    %cst_179 = arith.constant dense<0.000000e+00> : vector<16x16xf32>
    %216 = tpu.matmul %213, %215, %cst_179 {dimension_numbers = #tpu.dot_dimension_numbers<[1], [0], [0], [1], [0, 0, 1, 1], [], []>} : vector<16x16xbf16>, vector<16x16xbf16>, vector<16x16xf32> -> vector<16x16xf32>
    %217 = arith.addf %212, %216 : vector<16x16xf32>
    %218 = vector.extract_strided_slice %201 {offsets = [1, 0], sizes = [16, 16], strides = [1, 1]} : vector<22x16xbf16> to vector<16x16xbf16>
    %c1_180 = arith.constant 1 : index
    %c1_181 = arith.constant 1 : index
    %c0_182 = arith.constant 0 : index
    %c0_183 = arith.constant 0 : index
    %219 = vector.load %arg3[%c1_180, %c1_181, %c0_182, %c0_183] : memref<2x7x16x16xbf16, #tpu.memory_space<vmem>>, vector<1x1x16x16xbf16>
    %220 = vector.shape_cast %219 : vector<1x1x16x16xbf16> to vector<16x16xbf16>
    %cst_184 = arith.constant dense<0.000000e+00> : vector<16x16xf32>
    %221 = tpu.matmul %218, %220, %cst_184 {dimension_numbers = #tpu.dot_dimension_numbers<[1], [0], [0], [1], [0, 0, 1, 1], [], []>} : vector<16x16xbf16>, vector<16x16xbf16>, vector<16x16xf32> -> vector<16x16xf32>
    %222 = arith.addf %217, %221 : vector<16x16xf32>
    %223 = vector.extract_strided_slice %199 {offsets = [2, 0], sizes = [16, 16], strides = [1, 1]} : vector<22x16xbf16> to vector<16x16xbf16>
    %c0_185 = arith.constant 0 : index
    %c2_186 = arith.constant 2 : index
    %c0_187 = arith.constant 0 : index
    %c0_188 = arith.constant 0 : index
    %224 = vector.load %arg3[%c0_185, %c2_186, %c0_187, %c0_188] : memref<2x7x16x16xbf16, #tpu.memory_space<vmem>>, vector<1x1x16x16xbf16>
    %225 = vector.shape_cast %224 : vector<1x1x16x16xbf16> to vector<16x16xbf16>
    %cst_189 = arith.constant dense<0.000000e+00> : vector<16x16xf32>
    %226 = tpu.matmul %223, %225, %cst_189 {dimension_numbers = #tpu.dot_dimension_numbers<[1], [0], [0], [1], [0, 0, 1, 1], [], []>} : vector<16x16xbf16>, vector<16x16xbf16>, vector<16x16xf32> -> vector<16x16xf32>
    %227 = arith.addf %222, %226 : vector<16x16xf32>
    %228 = vector.extract_strided_slice %201 {offsets = [2, 0], sizes = [16, 16], strides = [1, 1]} : vector<22x16xbf16> to vector<16x16xbf16>
    %c1_190 = arith.constant 1 : index
    %c2_191 = arith.constant 2 : index
    %c0_192 = arith.constant 0 : index
    %c0_193 = arith.constant 0 : index
    %229 = vector.load %arg3[%c1_190, %c2_191, %c0_192, %c0_193] : memref<2x7x16x16xbf16, #tpu.memory_space<vmem>>, vector<1x1x16x16xbf16>
    %230 = vector.shape_cast %229 : vector<1x1x16x16xbf16> to vector<16x16xbf16>
    %cst_194 = arith.constant dense<0.000000e+00> : vector<16x16xf32>
    %231 = tpu.matmul %228, %230, %cst_194 {dimension_numbers = #tpu.dot_dimension_numbers<[1], [0], [0], [1], [0, 0, 1, 1], [], []>} : vector<16x16xbf16>, vector<16x16xbf16>, vector<16x16xf32> -> vector<16x16xf32>
    %232 = arith.addf %227, %231 : vector<16x16xf32>
    %233 = vector.extract_strided_slice %199 {offsets = [3, 0], sizes = [16, 16], strides = [1, 1]} : vector<22x16xbf16> to vector<16x16xbf16>
    %c0_195 = arith.constant 0 : index
    %c3_196 = arith.constant 3 : index
    %c0_197 = arith.constant 0 : index
    %c0_198 = arith.constant 0 : index
    %234 = vector.load %arg3[%c0_195, %c3_196, %c0_197, %c0_198] : memref<2x7x16x16xbf16, #tpu.memory_space<vmem>>, vector<1x1x16x16xbf16>
    %235 = vector.shape_cast %234 : vector<1x1x16x16xbf16> to vector<16x16xbf16>
    %cst_199 = arith.constant dense<0.000000e+00> : vector<16x16xf32>
    %236 = tpu.matmul %233, %235, %cst_199 {dimension_numbers = #tpu.dot_dimension_numbers<[1], [0], [0], [1], [0, 0, 1, 1], [], []>} : vector<16x16xbf16>, vector<16x16xbf16>, vector<16x16xf32> -> vector<16x16xf32>
    %237 = arith.addf %232, %236 : vector<16x16xf32>
    %238 = vector.extract_strided_slice %201 {offsets = [3, 0], sizes = [16, 16], strides = [1, 1]} : vector<22x16xbf16> to vector<16x16xbf16>
    %c1_200 = arith.constant 1 : index
    %c3_201 = arith.constant 3 : index
    %c0_202 = arith.constant 0 : index
    %c0_203 = arith.constant 0 : index
    %239 = vector.load %arg3[%c1_200, %c3_201, %c0_202, %c0_203] : memref<2x7x16x16xbf16, #tpu.memory_space<vmem>>, vector<1x1x16x16xbf16>
    %240 = vector.shape_cast %239 : vector<1x1x16x16xbf16> to vector<16x16xbf16>
    %cst_204 = arith.constant dense<0.000000e+00> : vector<16x16xf32>
    %241 = tpu.matmul %238, %240, %cst_204 {dimension_numbers = #tpu.dot_dimension_numbers<[1], [0], [0], [1], [0, 0, 1, 1], [], []>} : vector<16x16xbf16>, vector<16x16xbf16>, vector<16x16xf32> -> vector<16x16xf32>
    %242 = arith.addf %237, %241 : vector<16x16xf32>
    %243 = vector.extract_strided_slice %199 {offsets = [4, 0], sizes = [16, 16], strides = [1, 1]} : vector<22x16xbf16> to vector<16x16xbf16>
    %c0_205 = arith.constant 0 : index
    %c4_206 = arith.constant 4 : index
    %c0_207 = arith.constant 0 : index
    %c0_208 = arith.constant 0 : index
    %244 = vector.load %arg3[%c0_205, %c4_206, %c0_207, %c0_208] : memref<2x7x16x16xbf16, #tpu.memory_space<vmem>>, vector<1x1x16x16xbf16>
    %245 = vector.shape_cast %244 : vector<1x1x16x16xbf16> to vector<16x16xbf16>
    %cst_209 = arith.constant dense<0.000000e+00> : vector<16x16xf32>
    %246 = tpu.matmul %243, %245, %cst_209 {dimension_numbers = #tpu.dot_dimension_numbers<[1], [0], [0], [1], [0, 0, 1, 1], [], []>} : vector<16x16xbf16>, vector<16x16xbf16>, vector<16x16xf32> -> vector<16x16xf32>
    %247 = arith.addf %242, %246 : vector<16x16xf32>
    %248 = vector.extract_strided_slice %201 {offsets = [4, 0], sizes = [16, 16], strides = [1, 1]} : vector<22x16xbf16> to vector<16x16xbf16>
    %c1_210 = arith.constant 1 : index
    %c4_211 = arith.constant 4 : index
    %c0_212 = arith.constant 0 : index
    %c0_213 = arith.constant 0 : index
    %249 = vector.load %arg3[%c1_210, %c4_211, %c0_212, %c0_213] : memref<2x7x16x16xbf16, #tpu.memory_space<vmem>>, vector<1x1x16x16xbf16>
    %250 = vector.shape_cast %249 : vector<1x1x16x16xbf16> to vector<16x16xbf16>
    %cst_214 = arith.constant dense<0.000000e+00> : vector<16x16xf32>
    %251 = tpu.matmul %248, %250, %cst_214 {dimension_numbers = #tpu.dot_dimension_numbers<[1], [0], [0], [1], [0, 0, 1, 1], [], []>} : vector<16x16xbf16>, vector<16x16xbf16>, vector<16x16xf32> -> vector<16x16xf32>
    %252 = arith.addf %247, %251 : vector<16x16xf32>
    %253 = vector.extract_strided_slice %199 {offsets = [5, 0], sizes = [16, 16], strides = [1, 1]} : vector<22x16xbf16> to vector<16x16xbf16>
    %c0_215 = arith.constant 0 : index
    %c5_216 = arith.constant 5 : index
    %c0_217 = arith.constant 0 : index
    %c0_218 = arith.constant 0 : index
    %254 = vector.load %arg3[%c0_215, %c5_216, %c0_217, %c0_218] : memref<2x7x16x16xbf16, #tpu.memory_space<vmem>>, vector<1x1x16x16xbf16>
    %255 = vector.shape_cast %254 : vector<1x1x16x16xbf16> to vector<16x16xbf16>
    %cst_219 = arith.constant dense<0.000000e+00> : vector<16x16xf32>
    %256 = tpu.matmul %253, %255, %cst_219 {dimension_numbers = #tpu.dot_dimension_numbers<[1], [0], [0], [1], [0, 0, 1, 1], [], []>} : vector<16x16xbf16>, vector<16x16xbf16>, vector<16x16xf32> -> vector<16x16xf32>
    %257 = arith.addf %252, %256 : vector<16x16xf32>
    %258 = vector.extract_strided_slice %201 {offsets = [5, 0], sizes = [16, 16], strides = [1, 1]} : vector<22x16xbf16> to vector<16x16xbf16>
    %c1_220 = arith.constant 1 : index
    %c5_221 = arith.constant 5 : index
    %c0_222 = arith.constant 0 : index
    %c0_223 = arith.constant 0 : index
    %259 = vector.load %arg3[%c1_220, %c5_221, %c0_222, %c0_223] : memref<2x7x16x16xbf16, #tpu.memory_space<vmem>>, vector<1x1x16x16xbf16>
    %260 = vector.shape_cast %259 : vector<1x1x16x16xbf16> to vector<16x16xbf16>
    %cst_224 = arith.constant dense<0.000000e+00> : vector<16x16xf32>
    %261 = tpu.matmul %258, %260, %cst_224 {dimension_numbers = #tpu.dot_dimension_numbers<[1], [0], [0], [1], [0, 0, 1, 1], [], []>} : vector<16x16xbf16>, vector<16x16xbf16>, vector<16x16xf32> -> vector<16x16xf32>
    %262 = arith.addf %257, %261 : vector<16x16xf32>
    %263 = vector.extract_strided_slice %199 {offsets = [6, 0], sizes = [16, 16], strides = [1, 1]} : vector<22x16xbf16> to vector<16x16xbf16>
    %c0_225 = arith.constant 0 : index
    %c6_226 = arith.constant 6 : index
    %c0_227 = arith.constant 0 : index
    %c0_228 = arith.constant 0 : index
    %264 = vector.load %arg3[%c0_225, %c6_226, %c0_227, %c0_228] : memref<2x7x16x16xbf16, #tpu.memory_space<vmem>>, vector<1x1x16x16xbf16>
    %265 = vector.shape_cast %264 : vector<1x1x16x16xbf16> to vector<16x16xbf16>
    %cst_229 = arith.constant dense<0.000000e+00> : vector<16x16xf32>
    %266 = tpu.matmul %263, %265, %cst_229 {dimension_numbers = #tpu.dot_dimension_numbers<[1], [0], [0], [1], [0, 0, 1, 1], [], []>} : vector<16x16xbf16>, vector<16x16xbf16>, vector<16x16xf32> -> vector<16x16xf32>
    %267 = arith.addf %262, %266 : vector<16x16xf32>
    %268 = vector.extract_strided_slice %201 {offsets = [6, 0], sizes = [16, 16], strides = [1, 1]} : vector<22x16xbf16> to vector<16x16xbf16>
    %c1_230 = arith.constant 1 : index
    %c6_231 = arith.constant 6 : index
    %c0_232 = arith.constant 0 : index
    %c0_233 = arith.constant 0 : index
    %269 = vector.load %arg3[%c1_230, %c6_231, %c0_232, %c0_233] : memref<2x7x16x16xbf16, #tpu.memory_space<vmem>>, vector<1x1x16x16xbf16>
    %270 = vector.shape_cast %269 : vector<1x1x16x16xbf16> to vector<16x16xbf16>
    %cst_234 = arith.constant dense<0.000000e+00> : vector<16x16xf32>
    %271 = tpu.matmul %268, %270, %cst_234 {dimension_numbers = #tpu.dot_dimension_numbers<[1], [0], [0], [1], [0, 0, 1, 1], [], []>} : vector<16x16xbf16>, vector<16x16xbf16>, vector<16x16xf32> -> vector<16x16xf32>
    %272 = arith.addf %267, %271 : vector<16x16xf32>
    %273 = vector.broadcast %196 : f32 to vector<16x16xf32>
    %274 = arith.addf %272, %273 : vector<16x16xf32>
    %275 = arith.negf %274 : vector<16x16xf32>
    %276 = math.exp %275 : vector<16x16xf32>
    %cst_235 = arith.constant 1.000000e+00 : f32
    %277 = vector.broadcast %cst_235 : f32 to vector<16x16xf32>
    %278 = arith.addf %277, %276 : vector<16x16xf32>
    %279 = arith.divf %277, %278 : vector<16x16xf32>
    %280 = vector.shape_cast %107 : vector<4x16xf32> to vector<4x1x16xf32>
    %281 = vector.extract_strided_slice %191 {offsets = [0, 0], sizes = [4, 8], strides = [1, 1]} : vector<4x16xf32> to vector<4x8xf32>
    %282 = vector.shape_cast %281 : vector<4x8xf32> to vector<4x8x1xf32>
    %283 = vector.broadcast %280 : vector<4x1x16xf32> to vector<4x8x16xf32>
    %284 = vector.broadcast %282 : vector<4x8x1xf32> to vector<4x8x16xf32>
    %285 = arith.addf %283, %284 : vector<4x8x16xf32>
    %286 = vector.extract_strided_slice %279 {offsets = [0, 0], sizes = [8, 16], strides = [1, 1]} : vector<16x16xf32> to vector<8x16xf32>
    %287 = vector.shape_cast %286 : vector<8x16xf32> to vector<1x8x16xf32>
    %288 = vector.broadcast %287 : vector<1x8x16xf32> to vector<4x8x16xf32>
    %289 = arith.addf %285, %288 : vector<4x8x16xf32>
    %c0_236 = arith.constant 0 : index
    %c0_237 = arith.constant 0 : index
    %c0_238 = arith.constant 0 : index
    %c0_239 = arith.constant 0 : index
    %290 = vector.load %arg2[%c0_236, %c0_237, %c0_238, %c0_239] : memref<1x4x16x16xf32, #tpu.memory_space<vmem>>, vector<1x4x8x16xf32>
    %291 = vector.shape_cast %290 : vector<1x4x8x16xf32> to vector<4x8x16xf32>
    %cst_240 = arith.constant 0.333333343 : f32
    %292 = vector.broadcast %cst_240 : f32 to vector<4x8x16xf32>
    %293 = arith.mulf %292, %289 : vector<4x8x16xf32>
    %294 = arith.mulf %291, %293 : vector<4x8x16xf32>
    %c0_241 = arith.constant 0 : index
    %c0_242 = arith.constant 0 : index
    %c0_243 = arith.constant 0 : index
    %c0_244 = arith.constant 0 : index
    %295 = vector.load %arg6[%c0_241, %c0_242, %c0_243, %c0_244] : memref<1x4x16x16xf32, #tpu.memory_space<vmem>>, vector<1x4x8x16xf32>
    %296 = vector.shape_cast %295 : vector<1x4x8x16xf32> to vector<4x8x16xf32>
    %297 = vector.shape_cast %294 : vector<4x8x16xf32> to vector<1x4x8x16xf32>
    tpu.vector_store %arg6[%c0_241, %c0_242, %c0_243, %c0_244], %297 {strides = array<i32>} : memref<1x4x16x16xf32, #tpu.memory_space<vmem>>, vector<1x4x8x16xf32>,
    %298 = vector.shape_cast %107 : vector<4x16xf32> to vector<4x1x16xf32>
    %299 = vector.extract_strided_slice %191 {offsets = [0, 8], sizes = [4, 8], strides = [1, 1]} : vector<4x16xf32> to vector<4x8xf32>
    %300 = vector.shape_cast %299 : vector<4x8xf32> to vector<4x8x1xf32>
    %301 = vector.broadcast %298 : vector<4x1x16xf32> to vector<4x8x16xf32>
    %302 = vector.broadcast %300 : vector<4x8x1xf32> to vector<4x8x16xf32>
    %303 = arith.addf %301, %302 : vector<4x8x16xf32>
    %304 = vector.extract_strided_slice %279 {offsets = [8, 0], sizes = [8, 16], strides = [1, 1]} : vector<16x16xf32> to vector<8x16xf32>
    %305 = vector.shape_cast %304 : vector<8x16xf32> to vector<1x8x16xf32>
    %306 = vector.broadcast %305 : vector<1x8x16xf32> to vector<4x8x16xf32>
    %307 = arith.addf %303, %306 : vector<4x8x16xf32>
    %c0_245 = arith.constant 0 : index
    %c0_246 = arith.constant 0 : index
    %c8_247 = arith.constant 8 : index
    %c0_248 = arith.constant 0 : index
    %308 = vector.load %arg2[%c0_245, %c0_246, %c8_247, %c0_248] : memref<1x4x16x16xf32, #tpu.memory_space<vmem>>, vector<1x4x8x16xf32>
    %309 = vector.shape_cast %308 : vector<1x4x8x16xf32> to vector<4x8x16xf32>
    %cst_249 = arith.constant 0.333333343 : f32
    %310 = vector.broadcast %cst_249 : f32 to vector<4x8x16xf32>
    %311 = arith.mulf %310, %307 : vector<4x8x16xf32>
    %312 = arith.mulf %309, %311 : vector<4x8x16xf32>
    %c0_250 = arith.constant 0 : index
    %c0_251 = arith.constant 0 : index
    %c8_252 = arith.constant 8 : index
    %c0_253 = arith.constant 0 : index
    %313 = vector.load %arg6[%c0_250, %c0_251, %c8_252, %c0_253] : memref<1x4x16x16xf32, #tpu.memory_space<vmem>>, vector<1x4x8x16xf32>
    %314 = vector.shape_cast %313 : vector<1x4x8x16xf32> to vector<4x8x16xf32>
    %315 = vector.shape_cast %312 : vector<4x8x16xf32> to vector<1x4x8x16xf32>
    tpu.vector_store %arg6[%c0_250, %c0_251, %c8_252, %c0_253], %315 {strides = array<i32>} : memref<1x4x16x16xf32, #tpu.memory_space<vmem>>, vector<1x4x8x16xf32>,
    return
  }
  func.func @transform_0(%arg0: i32) -> i32 {
    %c0_i32 = arith.constant 0 : i32
    %c0_i32_0 = arith.constant 0 : i32
    return %c0_i32 : i32
  }
  func.func @transform_1(%arg0: i32) -> (i32, i32, i32, i32) {
    %c0_i32 = arith.constant 0 : i32
    %c0_i32_0 = arith.constant 0 : i32
    %c0_i32_1 = arith.constant 0 : i32
    %c0_i32_2 = arith.constant 0 : i32
    return %arg0, %c0_i32, %c0_i32_0, %c0_i32_1 : i32, i32, i32, i32
  }
  func.func @transform_2(%arg0: i32) -> (i32, i32, i32, i32) {
    %c0_i32 = arith.constant 0 : i32
    %c0_i32_0 = arith.constant 0 : i32
    %c0_i32_1 = arith.constant 0 : i32
    %c0_i32_2 = arith.constant 0 : i32
    %c0_i32_3 = arith.constant 0 : i32
    return %c0_i32, %c0_i32_0, %c0_i32_1, %c0_i32_2 : i32, i32, i32, i32
  }
  func.func @transform_3(%arg0: i32) -> (i32, i32, i32, i32) {
    %c0_i32 = arith.constant 0 : i32
    %c0_i32_0 = arith.constant 0 : i32
    %c0_i32_1 = arith.constant 0 : i32
    %c0_i32_2 = arith.constant 0 : i32
    %c0_i32_3 = arith.constant 0 : i32
    return %c0_i32, %c0_i32_0, %c0_i32_1, %c0_i32_2 : i32, i32, i32, i32
  }
  func.func @transform_4(%arg0: i32) -> (i32, i32, i32, i32) {
    %c0_i32 = arith.constant 0 : i32
    %c0_i32_0 = arith.constant 0 : i32
    %c0_i32_1 = arith.constant 0 : i32
    %c0_i32_2 = arith.constant 0 : i32
    %c0_i32_3 = arith.constant 0 : i32
    return %c0_i32, %c0_i32_0, %c0_i32_1, %c0_i32_2 : i32, i32, i32, i32
  }
  func.func @transform_5(%arg0: i32) -> (i32, i32, i32, i32) {
    %c0_i32 = arith.constant 0 : i32
    %c0_i32_0 = arith.constant 0 : i32
    %c0_i32_1 = arith.constant 0 : i32
    %c0_i32_2 = arith.constant 0 : i32
    return %arg0, %c0_i32, %c0_i32_0, %c0_i32_1 : i32, i32, i32, i32
  }
}

</mosaic_0001>

<bundles_post_ra>
// kernel: triplet_attention.1
= control target key start
LH: loop header
LB: loop body
LE: loop exit
PB: predicated region body
PF: predicated region fallthrough
CT: control target
= control target key end

     0   :  { %10 = vsyncpa [#allocation4], 0  ;;  %s3226_s0 = inlined_call_operand.vmem [shape: f32[3], index: 0, kind: input, shape index: {}]   ;;  %s3227_s1 = inlined_call_operand.vmem [shape: f32[2,4,16,16], index: 1, kind: input, shape index: {}]   ;;  %s3228_s2 = inlined_call_operand.vmem [shape: bf16[2,7,16,16], index: 2, kind: input, shape index: {}]   ;;  %s3229_s3 = inlined_call_operand.vmem [shape: bf16[2,7,16,16], index: 3, kind: input, shape index: {}]   ;;  %s3230_s4 = inlined_call_operand.vmem [shape: bf16[2,7,16,16], index: 4, kind: input, shape index: {}]   ;;  %s3231_s5 = inlined_call_operand.hbm [shape: f32[2,4,16,16], index: 5, kind: output, shape index: {}]  }
   0x1   :  { %11 = vsyncpa [#allocation3], 0 }
   0x2   :  { %13 = vsyncpa [#allocation3 + $0x1], 0  ;;  %s2681_s18 = smov 0   ;;  %s2683_s19 = smov 0  }
   0x3   :  { %s2685_s20 = smov 0   ;;  %s2687_s21 = smov 0  }
   0x4 LB: > { %s2702_s22 = sadd.s32 4294967295, %s2646_s21   ;;  %s2135_s23 = sadd.s32 4294967294, %s2646_s21   ;;  %s2646_s21 = sphi %s2687_s21, %s3241_s21   ;;  %s2642_s20 = sphi %s2685_s20, %s3240_s20   ;;  %s2638_s19 = sphi %s2683_s19, %s3239_s19   ;;  %s2634_s18 = sphi %s2681_s18, %s3238_s18  }
   0x5   : > { %s2706_s24 = sadd.s32 1, %s2646_s21   ;;  %s136_s25 = sadd.s32 1, %s2642_s20 }
   0x6   : > { %s133_s26 = ssub.s32 %s2646_s21, %s2706_s24  ;;  %p146_p0 = scmp.ne.s32.totalorder %s2642_s20, %s2638_s19 }
   0x7   : > { %p134_p1 = scmp.eq.s32.totalorder %s133_s26, 0  ;;  %p147_p2 = scmp.eq.s32.totalorder %s2702_s22, 1 }
   0x8   : > { %p152_p3 = scmp.ne.s32.totalorder %s2638_s19, %s2634_s18  ;;  %p153_p4 = scmp.eq.s32.totalorder %s2135_s23, 1 }
   0x9   : > { %s2717_s27 = scalar_select %p134_p1, %s2642_s20, %s136_s25  }
   0xa   : > { %p2719_p5 = por %p147_p2, %p146_p0  ;;  %p2723_p6 = por %p153_p4, %p152_p3 }
   0xb   : > { %p2136_p7 = scmp.ge.s32.totalorder %s2646_s21, 1  ;;  %p160_p8 = scmp.lt.s32.totalorder %s2646_s21, 3 }
   0xc   : > { %p2501_p9 = scmp.eq.s32.totalorder %s2702_s22, 0  ;;  %s172_s7 = sshll.u32 %s3226_s0, 4  ;;  %s173_s7 = int_to_ptr.vmem [resolvable:$true] %s172_s7 }
   0xd   : > { %p161_p10 = pnand %p2136_p7, %p160_p8  ;;  %s2648_s8 = smov [#allocation2]  }
   0xf   : > { %p2493_p11 = pneg %p161_p10  ;;  %202 = sbr.rel (%p161_p10) target bundleno = 571 (0x23b), region = 40 }
  0x11   : > { %p2494_p12 = pnand %p2501_p9, %p2493_p11 }
  0x13   : > { %2496 = dma.vmem_to_smem (!%p2494_p12), %s173_s7, 16, %s2648_s8, [#allocation4]  }
  0x14   : > { %2625 = dma.done.wait (%p2501_p9), [#allocation4], 16  }
  0x15   : > { %2627 = vsyncadd (%p2501_p9), [#allocation4], 4294967280 }
  0x16   : > { %209 = sfence }
  0x17   : > { %p232_p13 = scmp.lt.s32.totalorder %s2702_s22, 1  ;;  %vm242_vm0 = vcmask 130048   ;;  %vm490_vm1 = vcmask 1044484   ;;  %vm492_vm2 = vcmask 1045509   ;;  %vm494_vm3 = vcmask 1046534   ;;  %s2242_s7 = sld [smem:[#allocation2 + $0x2]] }
  0x18   : > { %vm498_vm4 = vcmask 1041408   ;;  %vm499_vm5 = vsmask.f32 1280  ;;  %vm502_vm6 = vcmask 1043456   ;;  %vm503_vm7 = vsmask.f32 3328 }
  0x19   : > { %s233_s9 = scalar_select %p232_p13, %s2702_s22, 1  ;;  %vm2853_vm8 = vmand %vm498_vm4, %vm499_vm5  ;;  %vm425_vm10 = vcmask 1041409   ;;  %vm427_vm11 = vcmask 1042434   ;;  %vm429_vm12 = vcmask 1043459   ;;  %vm445_vm13 = vcmask 64512  }
  0x1a   : > { %vm2865_vm9 = vmand %vm502_vm6, %vm503_vm7  ;;  %vm1481_vm14 = vsmask.f32 7424  ;;  %vm1562_vm15 = vcmask 1046528   ;;  %vm1836_vm4 = vcmask 1044480   ;;  %s2144_s8 = sld [smem:[#allocation2 + $0x1]]  ;;  %s2486_s14 = sshll.u32 %s2702_s22, 6 }
  0x1b   : > { %s2443_s10 = sshll.u32 %s233_s9, 6  ;;  %s3153_s9 = sld [smem:[#allocation2]] }
  0x1c   : > { %s2738_s13 = scalar_lea.vmem %s3227_s1, %s2443_s10  ;;  %s229_s10 = sand.u32 1, %s2638_s19  }
  0x1d   : > { %v2741_v0 = vld [vmem:[%s2738_s13 + $0x8] sm:$0xff]  ;;  %v2744_v1 = vld [vmem:[%s2738_s13] sm:$0xff]  ;;  %v2756_v6 = vld [vmem:[%s2738_s13 + $0x18] sm:$0xff]  ;;  %s2141_s11 = sshll.u32 %s229_s10, 6  ;;  %s2057_s17 = scalar_lea.hbm %s3231_s5, %s2486_s14 }
  0x1e   : > { %v2747_v2 = vld [vmem:[%s2738_s13 + $0x20] sm:$0xff]  ;;  %v353_v3 = vsel %vm242_vm0, %v2741_v0, 0.0  ;;  %v271_v4 = vsel %vm242_vm0, %v2744_v1, 0.0  ;;  %v2759_v7 = vld [vmem:[%s2738_s13 + $0x10] sm:$0xff]  ;;  %v2762_v8 = vld [vmem:[%s2738_s13 + $0x28] sm:$0xff]  ;;  %v360_v12 = vsel %vm242_vm0, %v2756_v6, 0.0 }
  0x1f   : > { %v285_v5 = vsel %vm242_vm0, %v2747_v2, 0.0  ;;  %397 = vadd.xlane.f32.xlu1 %v353_v3  ;;  %v354_v9 = vrot.slane %v353_v3, 4  ;;  %307 = vadd.xlane.f32.xlu0 %v271_v4  ;;  %v272_v10 = vrot.slane %v271_v4, 4  ;;  %v361_v13 = vrot.slane %v360_v12, 4  ;;  %v2771_v21 = vld [vmem:[%s2738_s13 + $0x38] sm:$0xff]  ;;  %v2776_v41 = vld [vmem:[%s2738_s13 + $0x30] sm:$0xff] }
  0x20   : > { %v286_v11 = vrot.slane %v285_v5, 4  ;;  %311 = vadd.xlane.f32.xlu2 %v285_v5  ;;  %v408_v14 = vadd.f32 %v360_v12, %v353_v3  ;;  %v278_v15 = vsel %vm242_vm0, %v2759_v7, 0.0  ;;  %v367_v16 = vsel %vm242_vm0, %v2762_v8, 0.0  ;;  %s3165_s12 = scalar_lea.vmem [#allocation5], %s2141_s11  ;;  %s2060_s25 = sshll.u32 %s2057_s17, 4  ;;  %s2061_s25 = int_to_ptr.hbm [resolvable:$true] %s2060_s25 }
  0x21   : > { %v355_v17 = vadd.f32 %v354_v9, %v353_v3  ;;  %v273_v18 = vadd.f32 %v272_v10, %v271_v4  ;;  %v279_v20 = vrot.slane %v278_v15, 4  ;;  %v362_v22 = vadd.f32 %v361_v13, %v360_v12  ;;  %s2058_s23 = sshll.u32 %s3165_s12, 4  ;;  %s2046_s22 = scalar_lea.sflag [#allocation3], %s229_s10  ;;  %s2059_s23 = int_to_ptr.vmem [resolvable:$true] %s2058_s23 }
  0x22   : > { %v287_v19 = vadd.f32 %v286_v11, %v285_v5  ;;  %v318_v23 = vadd.f32 %v278_v15, %v271_v4  ;;  %v368_v24 = vrot.slane %v367_v16, 4  ;;  %v409_v25 = vadd.f32 %v408_v14, %v367_v16  ;;  %s2594_s26 = sshra.s32 %s2061_s25, 4  ;;  %s2595_s26 = int_to_ptr.hbm [resolvable:$true] %s2594_s26 }
  0x23   : > { %v356_v26 = vrot.slane %v355_v17, 2  ;;  %v274_v27 = vrot.slane %v273_v18, 2  ;;  %v280_v29 = vadd.f32 %v279_v20, %v278_v15  ;;  %v363_v30 = vrot.slane %v362_v22, 2  ;;  %s2596_s30 = scalar_lea.hbm %s2595_s26, 64  ;;  %p2601_p3 = scmp.lt.s32.totalorder %s2595_s26, %s3231_s5 }
  0x24   : > { %v288_v28 = vrot.slane %v287_v19, 2  ;;  %v369_v31 = vadd.f32 %v368_v24, %v367_v16  ;;  %v374_v32 = vsel %vm242_vm0, %v2771_v21, 0.0  ;;  %v292_v53 = vsel %vm242_vm0, %v2776_v41, 0.0  ;;  %p2597_p0 = scmp.ne.s32.totalorder %s2595_s26, %s2596_s30 }
  0x25   : > { %v357_v33 = vadd.f32 %v356_v26, %v355_v17  ;;  %v275_v34 = vadd.f32 %v274_v27, %v273_v18  ;;  %v281_v36 = vrot.slane %v280_v29, 2  ;;  %v364_v37 = vadd.f32 %v363_v30, %v362_v22 }
  0x26   : > { %v289_v35 = vadd.f32 %v288_v28, %v287_v19  ;;  %v370_v38 = vrot.slane %v369_v31, 2  ;;  %v375_v39 = vrot.slane %v374_v32, 4  ;;  %v410_v40 = vadd.f32 %v409_v25, %v374_v32  ;;  %p2598_p1 = pnand %p2597_p0, %p2719_p5 }
  0x27   : > { %v358_v42 = vrot.slane %v357_v33, 1  ;;  %v276_v43 = vrot.slane %v275_v34, 1  ;;  %399 = vadd.xlane.f32.xlu1 %v360_v12  ;;  %v282_v45 = vadd.f32 %v281_v36, %v280_v29  ;;  %309 = vadd.xlane.f32.xlu0 %v278_v15  ;;  %v365_v46 = vrot.slane %v364_v37, 1 }
  0x28   : > { %v290_v44 = vrot.slane %v289_v35, 1  ;;  %v371_v47 = vadd.f32 %v370_v38, %v369_v31  ;;  %401 = vadd.xlane.f32.xlu2 %v367_v16  ;;  %v376_v48 = vadd.f32 %v375_v39, %v374_v32  ;;  %v1389_v49 = vmul.f32 0.25, %v410_v40  ;;  %p2599_p2 = pneg %p2598_p1 }
  0x29   : > { %v359_v50 = vadd.f32 %v358_v42, %v357_v33  ;;  %v277_v51 = vadd.f32 %v276_v43, %v275_v34  ;;  %v283_v52 = vrot.slane %v282_v45, 1  ;;  %v366_v55 = vadd.f32 %v365_v46, %v364_v37  ;;  %v2445_v33 = vld [vmem:[%s3229_s3 + $0x38] sm:$0xff]  ;;  %v2444_v34 = vld [vmem:[%s3229_s3] sm:$0xff] }
  0x2a   : > { %v291_v54 = vadd.f32 %v290_v44, %v289_v35  ;;  %v372_v56 = vrot.slane %v371_v47, 1  ;;  %v377_v57 = vrot.slane %v376_v48, 2  ;;  %v293_v60 = vrot.slane %v292_v53, 4  ;;  %550 = vmatpush.bf16.msra.mxu0 %v2445_v33  ;;  %572 = vmatpush.bf16.msra.mxu1 %v2444_v34 }
  0x2b   : > { %v385_v58 = vadd.f32 %v359_v50, %v277_v51  ;;  %v284_v59 = vadd.f32 %v283_v52, %v282_v45  ;;  %v319_v61 = vadd.f32 %v318_v23, %v285_v5  ;;  %v1410_v3 = vpack.c.bf16 %v1389_v49, %v1389_v49 }
  0x2c   : > { %v373_v62 = vadd.f32 %v372_v56, %v371_v47  ;;  %v378_v63 = vadd.f32 %v377_v57, %v376_v48  ;;  %v2782_v4 = vsel %vm242_vm0, %v2744_v1, -inf  ;;  %v294_v11 = vadd.f32 %v293_v60, %v292_v53  ;;  %v2446_v60 = vld [vmem:[%s3229_s3 + $0x8] sm:$0xff] }
  0x2d   : > { %v411_v9 = vmul.f32 0.0625, %v385_v58  ;;  %v386_v10 = vadd.f32 %v366_v55, %v284_v59  ;;  %v320_v12 = vadd.f32 %v319_v61, %v292_v53  ;;  %v244_v15 = vrot.slane %v2782_v4, 4  ;;  %v2447_v61 = vld [vmem:[%s3229_s3 + $0x40] sm:$0xff]  ;;  %603 = vmatpush.bf16.msra.mxu2 %v2446_v60 }
  0x2e   : > { %v387_v13 = vadd.f32 %v373_v62, %v291_v54  ;;  %v379_v14 = vrot.slane %v378_v63, 1  ;;  %v2787_v16 = vsel %vm242_vm0, %v2741_v0, -inf  ;;  %v295_v18 = vrot.slane %v294_v11, 2  ;;  %635 = vmatpush.bf16.msra.mxu3 %v2447_v61 }
  0x2f   : > { %v506_v5 = vpack.c.bf16 %v411_v9, %v411_v9  ;;  %v412_v17 = vmul.f32 0.0625, %v386_v10  ;;  %403 = vadd.xlane.f32.xlu1 %v374_v32  ;;  %313 = vadd.xlane.f32.xlu0 %v292_v53  ;;  %v1388_v19 = vmul.f32 0.25, %v320_v12  ;;  %v245_v20 = vmax.f32 %v2782_v4, %v244_v15 }
  0x30   : > { %v413_v1 = vmul.f32 0.0625, %v387_v13  ;;  %299 = vmax.xlane.f32.xlu2 %v2782_v4  ;;  %v326_v22 = vrot.slane %v2787_v16, 4  ;;  %v1414_v24 = vunpack.c.l.b16 %v1410_v3  ;;  %v296_v25 = vadd.f32 %v295_v18, %v294_v11 }
  0x31   : > { %v2792_v23 = vperm.slane %v506_v5, 0  ;;  %v1409_v26 = vpack.c.bf16 %v1388_v19, %v1388_v19  ;;  %v507_v0 = vpack.c.bf16 %v412_v17, %v412_v17  ;;  %v246_v27 = vrot.slane %v245_v20, 2 }
  0x32   : > { %v327_v28 = vmax.f32 %v2787_v16, %v326_v22  ;;  %v380_v29 = vadd.f32 %v379_v14, %v378_v63  ;;  %v297_v30 = vrot.slane %v296_v25, 1  ;;  %v250_v32 = vsel %vm242_vm0, %v2759_v7, -inf }
  0x33   : > { %v1413_v31 = vunpack.c.l.b16 %v1409_v26  ;;  %v508_v35 = vpack.c.bf16 %v413_v1, %v413_v1  ;;  %v247_v36 = vmax.f32 %v245_v20, %v246_v27  ;;  %v251_v38 = vrot.slane %v250_v32, 4  ;;  %v2448_v27 = vld [vmem:[%s3229_s3 + $0x10] sm:$0xff] }
  0x34   : > { %v328_v37 = vrot.slane %v327_v28, 2  ;;  %v518_v39 = vunpack.c.l.b16 %v2792_v23  ;;  %v298_v40 = vadd.f32 %v297_v30, %v296_v25  ;;  %v315_v43 = vmax.f32 %v2782_v4, %v250_v32  ;;  %663 = vmatpush.bf16.msrb.mxu0 %v2448_v27  ;;  %v2450_v23 = vld [vmem:[%s3229_s3 + $0x18] sm:$0xff] }
  0x35   : > { %v2804_v42 = vpack.c.b16 %v1414_v24, %v1413_v31  ;;  %v2807_v7 = vperm.slane %v507_v0, 0  ;;  %v248_v44 = vrot.slane %v247_v36, 1  ;;  %v252_v46 = vmax.f32 %v250_v32, %v251_v38  ;;  %720 = vmatpush.bf16.msrb.mxu2 %v2450_v23 }
  0x36   : > { %v329_v45 = vmax.f32 %v327_v28, %v328_v37  ;;  %v388_v47 = vadd.f32 %v380_v29, %v298_v40  ;;  %v2812_v48 = vsel %vm242_vm0, %v2756_v6, -inf  ;;  %v2816_v49 = vsel %vm242_vm0, %v2762_v8, -inf  ;;  %v2449_v28 = vld [vmem:[%s3229_s3 + $0x48] sm:$0xff] }
  0x37   : > { %389 = vmax.xlane.f32.xlu1 %v2787_v16  ;;  %301 = vmax.xlane.f32.xlu0 %v250_v32  ;;  %v257_v50 = vsel %vm242_vm0, %v2747_v2, -inf  ;;  %v249_v51 = vmax.f32 %v247_v36, %v248_v44  ;;  %v253_v53 = vrot.slane %v252_v46, 2  ;;  %v333_v54 = vrot.slane %v2812_v48, 4 }
  0x38   : > { %v330_v52 = vrot.slane %v329_v45, 1  ;;  %391 = vmax.xlane.f32.xlu2 %v2812_v48  ;;  %v414_v55 = vmul.f32 0.0625, %v388_v47  ;;  %v405_v56 = vmax.f32 %v2787_v16, %v2812_v48  ;;  %v340_v6 = vrot.slane %v2816_v49, 4  ;;  %691 = vmatpush.bf16.msrb.mxu1 %v2449_v28 }
  0x39   : > { %v258_v57 = vrot.slane %v257_v50, 4  ;;  %v254_v8 = vmax.f32 %v252_v46, %v253_v53  ;;  %v334_v59 = vmax.f32 %v2812_v48, %v333_v54  ;;  %v264_v2 = vsel %vm242_vm0, %v2776_v41, -inf }
  0x3a   : > { %v331_v58 = vmax.f32 %v329_v45, %v330_v52  ;;  %v509_v62 = vpack.c.bf16 %v414_v55, %v414_v55  ;;  %v341_v63 = vmax.f32 %v2816_v49, %v340_v6  ;;  %v265_v4 = vrot.slane %v264_v2, 4 }
  0x3b   : > { %v259_v3 = vmax.f32 %v257_v50, %v258_v57  ;;  %v255_v10 = vrot.slane %v254_v8, 1  ;;  %v335_v11 = vrot.slane %v334_v59, 2  ;;  %v316_v12 = vmax.f32 %v257_v50, %v264_v2 }
  0x3c   : > { %v381_v9 = vmax.f32 %v249_v51, %v331_v58  ;;  %v516_v41 = vperm.slane %v508_v35, 0  ;;  %v342_v13 = vrot.slane %v341_v63, 2  ;;  %v266_v15 = vmax.f32 %v264_v2, %v265_v4 }
  0x3d   : > { %v260_v14 = vrot.slane %v259_v3, 2  ;;  %v519_v16 = vunpack.c.l.b16 %v2807_v7  ;;  %v517_v5 = vperm.slane %v509_v62, 0  ;;  %v336_v17 = vmax.f32 %v334_v59, %v335_v11  ;;  %v2468_v62 = vld [vmem:[%s3230_s4 + $0x28] sm:$0xff] }
  0x3e   : > { %v317_v18 = vmax.f32 %v315_v43, %v316_v12  ;;  %v474_v19 = vpack.c.bf16 %v381_v9, %v381_v9  ;;  %v343_v1 = vmax.f32 %v341_v63, %v342_v13  ;;  %v267_v22 = vrot.slane %v266_v15, 2 }
  0x3f   : > { %393 = vmax.xlane.f32.xlu1 %v2816_v49  ;;  %v261_v20 = vmax.f32 %v259_v3, %v260_v14  ;;  %303 = vmax.xlane.f32.xlu0 %v257_v50  ;;  %v256_v24 = vmax.f32 %v254_v8, %v255_v10  ;;  %v337_v25 = vrot.slane %v336_v17, 1  ;;  %v346_v0 = vsel %vm242_vm0, %v2771_v21, -inf }
  0x40   : > { %305 = vmax.xlane.f32.xlu2 %v264_v2  ;;  %v1391_v26 = vpack.c.bf16 %v317_v18, %v317_v18  ;;  %v344_v29 = vrot.slane %v343_v1, 1  ;;  %v268_v31 = vmax.f32 %v266_v15, %v267_v22  ;;  %v347_v32 = vrot.slane %v346_v0, 4 }
  0x41   : > { %v262_v30 = vrot.slane %v261_v20, 1  ;;  %v520_v33 = vunpack.c.l.b16 %v516_v41  ;;  %v521_v34 = vunpack.c.l.b16 %v517_v5  ;;  %v338_v35 = vmax.f32 %v336_v17, %v337_v25 }
  0x42   : > { %v406_v36 = vmax.f32 %v2816_v49, %v346_v0  ;;  %v482_v21 = vperm.slane %v474_v19, 0  ;;  %v345_v37 = vmax.f32 %v343_v1, %v344_v29  ;;  %v348_v40 = vmax.f32 %v346_v0, %v347_v32 }
  0x43   : > { %v263_v38 = vmax.f32 %v261_v20, %v262_v30  ;;  %v382_v43 = vmax.f32 %v256_v24, %v338_v35  ;;  %v269_v7 = vrot.slane %v268_v31, 1  ;;  %v1395_v44 = vunpack.c.l.b16 %v1391_v26  ;;  %v2453_v35 = vld [vmem:[%s3229_s3 + $0x58] sm:$0xff] }
  0x44   : > { %v407_v45 = vmax.f32 %v405_v56, %v406_v36  ;;  %v349_v47 = vrot.slane %v348_v40, 2  ;;  %v522_v54 = vsel %vm490_vm1, %v519_v16, %v518_v39  ;;  %v2451_v39 = vld [vmem:[%s3229_s3 + $0x50] sm:$0xff]  ;;  %v486_v2 = vunpack.c.l.b16 %v482_v21  ;;  %v2454_v21 = vld [vmem:[%s3229_s3 + $0x28] sm:$0xff] }
  0x45   : > { %v383_v46 = vmax.f32 %v263_v38, %v345_v37  ;;  %v475_v48 = vpack.c.bf16 %v382_v43, %v382_v43  ;;  %v270_v55 = vmax.f32 %v268_v31, %v269_v7  ;;  %v523_v6 = vsel %vm492_vm2, %v520_v33, %v522_v54  ;;  %749 = vmatpush.bf16.msrb.mxu3 %v2451_v39  ;;  %v2455_v7 = vld [vmem:[%s3229_s3 + $0x60] sm:$0xff] }
  0x46   : > { %v1392_v50 = vpack.c.bf16 %v407_v45, %v407_v45  ;;  %v350_v49 = vmax.f32 %v348_v40, %v349_v47  ;;  %v524_v59 = vsel %vm494_vm3, %v521_v34, %v523_v6  ;;  %v2452_v34 = vld [vmem:[%s3229_s3 + $0x20] sm:$0xff]  ;;  %v2456_v47 = vld [vmem:[%s3229_s3 + $0x30] sm:$0xff]  ;;  %v419_v54 = vlaneseq }
  0x47   : > { %v476_v51 = vpack.c.bf16 %v383_v46, %v383_v46  ;;  %395 = vmax.xlane.f32.xlu0 %v346_v0  ;;  %v483_v52 = vperm.slane %v475_v48, 0  ;;  %v525_v63 = vpack.c.b16 %v524_v59, %v524_v59  ;;  %v2457_v48 = vld [vmem:[%s3229_s3 + $0x68] sm:$0xff]  ;;  %v2461_v6 = vld [vmem:[%s3230_s4 + $0x40] sm:$0xff] }
  0x48   : > { %v1396_v53 = vunpack.c.l.b16 %v1392_v50  ;;  %v351_v56 = vrot.slane %v350_v49, 1 }
  0x49   : > { %v484_v57 = vperm.slane %v476_v51, 0  ;;  %v487_v60 = vunpack.c.l.b16 %v483_v52  ;;  %v527_v4 = vsel %vm2853_vm8, 0, %v525_v63 }
  0x4a   : > { %v2850_v58 = vpack.c.b16 %v1396_v53, %v1395_v44  ;;  %v352_v61 = vmax.f32 %v350_v49, %v351_v56  ;;  %v528_v10 = vsel %vm2865_vm9, %v527_v4, 0  ;;  %v2459_v53 = vld [vmem:[%s3230_s4 + $0x38] sm:$0xff]  ;;  %v2916_v56 = vand.u32 127, %v419_v54 }
  0x4b   : > { %v488_v9 = vunpack.c.l.b16 %v484_v57  ;;  %2151 = vmatmul.msk.bf16.vlgmr.msra.gmra.mxu0 %vm242_vm0, %v528_v10  ;;  %v491_v12 = vsel %vm490_vm1, %v487_v60, %v486_v2  ;;  %v613_v41 = vshrl.u32 %v528_v10, 16  ;;  %v615_v13 = vshll.u32 %v528_v10, 16 }
  0x4c   : > { %v384_v3 = vmax.f32 %v270_v55, %v352_v61  ;;  %v674_v30 = vrot.slane %v528_v10, 1  ;;  %776 = vmatpush.bf16.msra.mxu0 %v2452_v34  ;;  %v786_v37 = vrot.slane %v528_v10, 2  ;;  %v898_v51 = vrot.slane %v528_v10, 3 }
  0x4d   : > { %v617_v15 = vrot.slane %v615_v13, 1  ;;  %v493_v16 = vsel %vm492_vm2, %v488_v9, %v491_v12  ;;  %v730_v0 = vrot.slane %v613_v41, 1  ;;  %v731_v27 = vrot.slane %v615_v13, 2 }
  0x4e   : > { %v477_v11 = vpack.c.bf16 %v384_v3, %v384_v3  ;;  %v842_v40 = vrot.slane %v613_v41, 2  ;;  %v843_v44 = vrot.slane %v615_v13, 3  ;;  %v2922_v57 = vadd.s32 4294967288, %v2916_v56 }
  0x4f   : > { %v618_v17 = vor.u32 %v617_v15, %v613_v41  ;;  %v732_v29 = vor.u32 %v731_v27, %v730_v0  ;;  %vm1627_vm1 = vsmask.f32 6400  ;;  %vm1702_vm2 = vcmask 1045504  }
  0x50   : > { %v485_v14 = vperm.slane %v477_v11, 0  ;;  %v844_v46 = vor.u32 %v843_v44, %v842_v40 }
  0x51   : > { %2170 = vmatmul.msk.bf16.vlgmr.msra.gmra.mxu3 %vm242_vm0, %v618_v17 }
  0x52   : > { %v489_v5 = vunpack.c.l.b16 %v485_v14  ;;  %861 = vmatpush.bf16.msra.mxu3 %v2455_v7 }
  0x54   : > { %v495_v18 = vsel %vm494_vm3, %v489_v5, %v493_v16  ;;  %vm1765_vm3 = vsmask.f32 5376 }
  0x55   : > { %v496_v19 = vpack.c.b16 %v495_v18, %v495_v18 }
  0x57   : > { %v501_v1 = vsel %vm2853_vm8, 0, %v496_v19 }
  0x58   : > { %v505_v20 = vsel %vm2865_vm9, %v501_v1, 0  ;;  %v2458_v1 = vld [vmem:[%s3230_s4] sm:$0xff] }
  0x59   : > { %2156 = vmatmul.msk.bf16.vlgmr.msra.gmra.mxu1 %vm242_vm0, %v505_v20  ;;  %v581_v22 = vshrl.u32 %v505_v20, 16  ;;  %v583_v24 = vshll.u32 %v505_v20, 16  ;;  %v646_v25 = vrot.slane %v505_v20, 1  ;;  %v759_v36 = vrot.slane %v505_v20, 2 }
  0x5a   : > { %803 = vmatpush.bf16.msra.mxu1 %v2453_v35  ;;  %v871_v50 = vrot.slane %v505_v20, 3  ;;  %v2465_v20 = vld [vmem:[%s3230_s4 + $0x50] sm:$0xff] }
  0x5b   : > { %v585_v26 = vrot.slane %v583_v24, 1  ;;  %2177 = vmatmul.msk.bf16.vlgmr.msrb.gmra.mxu0 %vm242_vm0, %v646_v25  ;;  %v701_v31 = vrot.slane %v581_v22, 1  ;;  %v702_v32 = vrot.slane %v583_v24, 2  ;;  %v813_v38 = vrot.slane %v581_v22, 2 }
  0x5c   : > { %v814_v43 = vrot.slane %v583_v24, 3  ;;  %888 = vmatpush.bf16.msrb.mxu0 %v2456_v47 }
  0x5d   : > { %v586_v28 = vor.u32 %v585_v26, %v581_v22  ;;  %v703_v33 = vor.u32 %v702_v32, %v701_v31  ;;  %v2462_v22 = vld [vmem:[%s3230_s4 + $0x10] sm:$0xff] }
  0x5e   : > { %v815_v45 = vor.u32 %v814_v43, %v813_v38  ;;  %v2466_v38 = vld [vmem:[%s3230_s4 + $0x20] sm:$0xff] }
  0x5f   : > { %2163 = vmatmul.msk.bf16.vlgmr.msra.gmra.mxu2 %vm242_vm0, %v586_v28 }
  0x60   : > { %832 = vmatpush.bf16.msra.mxu2 %v2454_v21 }
  0x61   : > { %2198 = vmatmul.msk.bf16.vlgmr.msrb.gmra.mxu3 %vm242_vm0, %v732_v29  ;;  %v2460_v29 = vld [vmem:[%s3230_s4 + $0x8] sm:$0xff] }
  0x62   : > { %1017 = vmatpush.bf16.msrb.mxu3 %v2458_v1 }
  0x69   : > { %2184 = vmatmul.msk.bf16.vlgmr.msrb.gmra.mxu1 %vm242_vm0, %v674_v30  ;;  %v2463_v30 = vld [vmem:[%s3230_s4 + $0x48] sm:$0xff] }
  0x6a   : > { %915 = vmatpush.bf16.msrb.mxu1 %v2457_v48 }
  0x6b   : > { %2205 = vmatmul.msk.bf16.vlgmr.msra.gmra.mxu0 %vm242_vm0, %v759_v36 }
  0x6c   : > { %1048 = vmatpush.bf16.msra.mxu0 %v2460_v29 }
  0x6f   : > { %2191 = vmatmul.msk.bf16.vlgmr.msrb.gmra.mxu2 %vm242_vm0, %v703_v33 }
  0x70   : > { %995 = vmatpush.bf16.msrb.mxu2 %v2459_v53 }
  0x71   : > { %2226 = vmatmul.msk.bf16.vlgmr.msra.gmra.mxu3 %vm242_vm0, %v844_v46 }
  0x72   : > { %1136 = vmatpush.bf16.msra.mxu3 %v2463_v30 }
  0x79   : > { %2212 = vmatmul.msk.bf16.vlgmr.msra.gmra.mxu1 %vm242_vm0, %v786_v37 }
  0x7a   : > { %1080 = vmatpush.bf16.msra.mxu1 %v2461_v6 }
  0x7b   : > { %2233 = vmatmul.msk.bf16.vlgmr.msrb.gmra.mxu0 %vm242_vm0, %v871_v50 }
  0x7f   : > { %2219 = vmatmul.msk.bf16.vlgmr.msra.gmra.mxu2 %vm242_vm0, %v815_v45 }
  0x80   : > { %1108 = vmatpush.bf16.msra.mxu2 %v2462_v22 }
  0x89   : > { %2240 = vmatmul.msk.bf16.vlgmr.msrb.gmra.mxu1 %vm242_vm0, %v898_v51 }
  0x8a   : > { %1194 = vmatpush.bf16.msrb.mxu1 %v2465_v20 }
  0x92   : > { %v398_v49 = vpop.xlane.xlu1 %397  ;;  %v308_v52 = vpop.xlane.xlu0 %307 }
  0x93   : > { %v312_v55 = vpop.xlane.xlu2 %311  ;;  %v463_v2 = vperm.slane %v398_v49, %v2922_v57  ;;  %v451_v63 = vperm.slane %v308_v52, %v2916_v56 }
  0x94   : > { %v453_v3 = vperm.slane %v312_v55, %v2916_v56 }
  0x9a   : > { %v400_v59 = vpop.xlane.xlu1 %399  ;;  %v310_v23 = vpop.xlane.xlu0 %309 }
  0x9b   : > { %v402_v39 = vpop.xlane.xlu2 %401  ;;  %v464_v60 = vperm.slane %v400_v59, %v2922_v57  ;;  %v452_v61 = vperm.slane %v310_v23, %v2916_v56  ;;  %v2469_v23 = vld [vmem:[%s3230_s4 + $0x60] sm:$0xff] }
  0x9c   : > { %v465_v4 = vperm.slane %v402_v39, %v2922_v57 }
  0x9d   : > { %v467_v9 = vsel %vm425_vm10, %v464_v60, %v463_v2  ;;  %v455_v10 = vsel %vm425_vm10, %v452_v61, %v451_v63 }
  0x9e   : > { %v468_v15 = vsel %vm427_vm11, %v465_v4, %v467_v9  ;;  %v456_v16 = vsel %vm427_vm11, %v453_v3, %v455_v10 }
  0xa2   : > { %v404_v11 = vpop.xlane.xlu1 %403  ;;  %v314_v12 = vpop.xlane.xlu0 %313 }
  0xa3   : > { %v466_v41 = vperm.slane %v404_v11, %v2922_v57  ;;  %v454_v13 = vperm.slane %v314_v12, %v2916_v56  ;;  %v300_v14 = vpop.xlane.xlu2 %299 }
  0xa4   : > { %v421_v21 = vperm.slane %v300_v14, %v2916_v56 }
  0xa5   : > { %v469_v5 = vsel %vm429_vm12, %v466_v41, %v468_v15  ;;  %v457_v17 = vsel %vm429_vm12, %v454_v13, %v456_v16  ;;  %v2467_v16 = vld [vmem:[%s3230_s4 + $0x58] sm:$0xff] }
  0xa6   : > { %v471_v18 = vsel %vm445_vm13, %v457_v17, %v469_v5 }
  0xa7   : > { %v472_v19 = vmul.f32 0.0625, %v471_v18 }
  0xa9   : > { %v959_v24 = vpack.c.bf16 %v472_v19, %v472_v19  ;;  %v2470_v19 = vld [vmem:[%s3230_s4 + $0x30] sm:$0xff] }
  0xaa   : > { %v302_v25 = vpop.xlane.xlu0 %301  ;;  %v390_v0 = vpop.xlane.xlu1 %389 }
  0xab   : > { %v961_v26 = vunpack.c.l.b16 %v959_v24  ;;  %v392_v27 = vpop.xlane.xlu2 %391  ;;  %v422_v37 = vperm.slane %v302_v25, %v2916_v56  ;;  %v437_v40 = vperm.slane %v390_v0, %v2922_v57 }
  0xac   : > { %v438_v43 = vperm.slane %v392_v27, %v2922_v57 }
  0xad   : > { %v962_v28 = vpack.c.b16 %v961_v26, %v961_v26  ;;  %v426_v50 = vsel %vm425_vm10, %v422_v37, %v421_v21 }
  0xae   : > { %v441_v49 = vsel %vm425_vm10, %v438_v43, %v437_v40 }
  0xaf   : > { %v964_v31 = vshrl.u32 %v962_v28, 16  ;;  %v967_v32 = vshll.u32 %v962_v28, 16 }
  0xb1   : > { %v966_v33 = vrot.slane %v964_v31, 6  ;;  %v969_v34 = vrot.slane %v967_v32, 7  ;;  %v2471_v31 = vld [vmem:[%s3230_s4 + $0x68] sm:$0xff] }
  0xb2   : > { %v304_v35 = vpop.xlane.xlu0 %303  ;;  %v394_v7 = vpop.xlane.xlu1 %393 }
  0xb3   : > { %v970_v36 = vor.u32 %v969_v34, %v966_v33  ;;  %v423_v45 = vperm.slane %v304_v35, %v2916_v56  ;;  %v306_v46 = vpop.xlane.xlu2 %305  ;;  %v439_v51 = vperm.slane %v394_v7, %v2922_v57 }
  0xb4   : > { %v424_v52 = vperm.slane %v306_v46, %v2916_v56  ;;  %v2464_v56 = vld [vmem:[%s3230_s4 + $0x18] sm:$0xff] }
  0xb5   : > { %v972_v44 = vsel %vm2853_vm8, 0, %v970_v36  ;;  %v428_v6 = vsel %vm427_vm11, %v423_v45, %v426_v50  ;;  %v442_v60 = vsel %vm427_vm11, %v439_v51, %v441_v49  ;;  %1165 = vmatpush.bf16.msrb.mxu0 %v2464_v56 }
  0xb6   : > { %v2966_v47 = vsel %vm2865_vm9, %v972_v44, 0  ;;  %v430_v61 = vsel %vm429_vm12, %v424_v52, %v428_v6 }
  0xb7   : > { %2249 = vmatmul.msk.bf16.vlgmr.msrb.gmra.mxu2 %vm242_vm0, %v2966_v47  ;;  %v1060_v48 = vshll.u32 %v2966_v47, 16  ;;  %v1058_v53 = vshrl.u32 %v2966_v47, 16  ;;  %v1119_v32 = vrot.slane %v2966_v47, 1  ;;  %v1231_v49 = vrot.slane %v2966_v47, 2 }
  0xb8   : > { %1221 = vmatpush.bf16.msrb.mxu2 %v2466_v38 }
  0xb9   : > { %v1062_v55 = vrot.slane %v1060_v48, 1  ;;  %v1175_v13 = vrot.slane %v1058_v53, 1  ;;  %v1176_v14 = vrot.slane %v1060_v48, 2  ;;  %v1287_v0 = vrot.slane %v1058_v53, 2 }
  0xba   : > { %v396_v59 = vpop.xlane.xlu0 %395  ;;  %v1288_v27 = vrot.slane %v1060_v48, 3 }
  0xbb   : > { %v440_v39 = vperm.slane %v396_v59, %v2922_v57  ;;  %v1063_v2 = vor.u32 %v1062_v55, %v1058_v53  ;;  %v1177_v17 = vor.u32 %v1176_v14, %v1175_v13  ;;  %v2472_v13 = vld [vmem:[%s3228_s2] sm:$0xff]  ;;  %v1417_v14 = vshrl.u32 %v2804_v42, 16 }
  0xbc   : > { %v1289_v33 = vor.u32 %v1288_v27, %v1287_v0 }
  0xbd   : > { %v443_v63 = vsel %vm429_vm12, %v440_v39, %v442_v60  ;;  %2268 = vmatmul.msk.bf16.vlgmr.msra.gmra.mxu1 %vm242_vm0, %v1063_v2 }
  0xbe   : > { %v446_v3 = vsel %vm445_vm13, %v430_v61, %v443_v63  ;;  %1306 = vmatpush.bf16.msra.mxu1 %v2469_v23 }
  0xbf   : > { %v944_v4 = vpack.c.bf16 %v446_v3, %v446_v3 }
  0xc1   : > { %v946_v9 = vunpack.c.l.b16 %v944_v4 }
  0xc3   : > { %v947_v57 = vpack.c.b16 %v946_v9, %v946_v9 }
  0xc5   : > { %v949_v10 = vshrl.u32 %v947_v57, 16  ;;  %v952_v11 = vshll.u32 %v947_v57, 16  ;;  %v1343_v57 = vrot.slane %v2966_v47, 3  ;;  %v1402_v47 = vshll.u32 %v2850_v58, 16 }
  0xc7   : > { %v951_v12 = vrot.slane %v949_v10, 6  ;;  %v954_v41 = vrot.slane %v952_v11, 7 }
  0xc8   : > { %v552_v25 = vpop.f32.mrf.mxu0 }
  0xc9   : > { %v955_v15 = vor.u32 %v954_v41, %v951_v12  ;;  %v2473_v41 = vld [vmem:[%s3228_s2 + $0x38] sm:$0xff] }
  0xcb   : > { %v957_v5 = vsel %vm2853_vm8, 0, %v955_v15  ;;  %v1420_v15 = vshll.u32 %v2804_v42, 16  ;;  %v1419_v42 = vrot.slane %v1417_v14, 6 }
  0xcc   : > { %v958_v18 = vsel %vm2865_vm9, %v957_v5, 0 }
  0xcd   : > { %2254 = vmatmul.msk.bf16.vlgmr.msrb.gmra.mxu3 %vm242_vm0, %v958_v18  ;;  %v1028_v1 = vshll.u32 %v958_v18, 16  ;;  %2296 = vmatmul.msk.bf16.vlgmr.msrb.gmra.mxu1 %vm242_vm0, %v1177_v17  ;;  %v1091_v20 = vrot.slane %v958_v18, 1  ;;  %v1026_v22 = vshrl.u32 %v958_v18, 16  ;;  %v1204_v34 = vrot.slane %v958_v18, 2  ;;  %v2474_v17 = vld [vmem:[%s3228_s2 + $0x8] sm:$0xff] }
  0xce   : > { %1248 = vmatpush.bf16.msrb.mxu3 %v2467_v16  ;;  %v1316_v53 = vrot.slane %v958_v18, 3  ;;  %v1399_v16 = vshrl.u32 %v2850_v58, 16  ;;  %v2475_v18 = vld [vmem:[%s3228_s2 + $0x40] sm:$0xff]  ;;  %1471 = vmatpush.bf16.msrb.mxu1 %v2472_v13  ;;  %v2477_v58 = vld [vmem:[%s3228_s2 + $0x48] sm:$0xff] }
  0xcf   : > { %2275 = vmatmul.msk.bf16.vlgmr.msra.gmra.mxu2 %vm242_vm0, %v1091_v20  ;;  %v1030_v24 = vrot.slane %v1028_v1, 1  ;;  %v1146_v35 = vrot.slane %v1026_v22, 1  ;;  %v1147_v36 = vrot.slane %v1028_v1, 2  ;;  %v1258_v55 = vrot.slane %v1026_v22, 2 }
  0xd0   : > { %1333 = vmatpush.bf16.msra.mxu2 %v2470_v19  ;;  %v554_v29 = vpop.f32.mrf.mxu0  ;;  %v1259_v6 = vrot.slane %v1028_v1, 3  ;;  %v2476_v19 = vld [vmem:[%s3228_s2 + $0x10] sm:$0xff]  ;;  %v1422_v1 = vrot.slane %v1420_v15, 7  ;;  %v1401_v20 = vrot.slane %v1399_v16, 6 }
  0xd1   : > { %v1031_v26 = vor.u32 %v1030_v24, %v1026_v22  ;;  %v1148_v40 = vor.u32 %v1147_v36, %v1146_v35  ;;  %v1404_v22 = vrot.slane %v1402_v47, 7 }
  0xd2   : > { %v1260_v39 = vor.u32 %v1259_v6, %v1258_v55 }
  0xd3   : > { %2261 = vmatmul.msk.bf16.vlgmr.msra.gmra.mxu0 %vm242_vm0, %v1031_v26  ;;  %v1423_v26 = vor.u32 %v1422_v1, %v1419_v42  ;;  %v1405_v0 = vor.u32 %v1404_v22, %v1401_v20 }
  0xd4   : > { %1277 = vmatpush.bf16.msra.mxu0 %v2468_v62  ;;  %v637_v21 = vpop.f32.mrf.mxu3 }
  0xd5   : > { %v3048_v29 = vsel %vm2853_vm8, %v1423_v26, 0 }
  0xd6   : > { %v574_v28 = vpop.f32.mrf.mxu1  ;;  %v1735_v22 = vrot.slane %v3048_v29, 2 }
  0xd7   : > { %v575_v30 = vadd.f32 %v574_v28, %v552_v25  ;;  %v3044_v28 = vsel %vm2853_vm8, 0, %v1423_v26 }
  0xd8   : > { %v665_v38 = vpop.f32.mrf.mxu0  ;;  %v3069_v35 = vshrl.u32 %v3044_v28, 16  ;;  %v3075_v8 = vshll.u32 %v3044_v28, 16  ;;  %v1734_v20 = vrot.slane %v3044_v28, 2 }
  0xda   : > { %v1736_v26 = vsel %vm1702_vm2, %v1734_v20, %v1735_v22  ;;  %v1943_v20 = vshrl.u32 %v419_v54, 7 }
  0xdc   : > { %v639_v44 = vpop.f32.mrf.mxu3  ;;  %2541 = vset.pattern.permute.xlu0 %v1943_v20  ;;  %2540 = vset.pattern.permute.xlu2 %v1943_v20 }
  0xdd   : > { %2282 = vmatmul.msk.bf16.vlgmr.msra.gmra.mxu3 %vm242_vm0, %v1119_v32  ;;  %2324 = vmatmul.msk.bf16.vlgmr.msra.gmra.mxu1 %vm242_vm0, %v1289_v33  ;;  %v3058_v32 = vsel %vm2853_vm8, %v1405_v0, 0  ;;  %v1525_v44 = vrot.slane %v3075_v8, 1 }
  0xde   : > { %1360 = vmatpush.bf16.msra.mxu3 %v2471_v31  ;;  %v576_v37 = vpop.f32.mrf.mxu1  ;;  %1615 = vmatpush.bf16.msra.mxu1 %v2477_v58  ;;  %v1564_v6 = vrot.slane %v3058_v32, 1  ;;  %v1704_v42 = vrot.slane %v3058_v32, 2  ;;  %v2482_v58 = vld [vmem:[%s3228_s2 + $0x28] sm:$0xff] }
  0xdf   : > { %2303 = vmatmul.msk.bf16.vlgmr.msrb.gmra.mxu2 %vm242_vm0, %v1204_v34  ;;  %v3078_v37 = vshll.u32 %v3048_v29, 16  ;;  %2539 = vset.pattern.permute.xlu1 %v1943_v20 }
  0xe0   : > { %v667_v48 = vpop.f32.mrf.mxu0  ;;  %1509 = vmatpush.bf16.msrb.mxu2 %v2474_v17  ;;  %v2480_v17 = vld [vmem:[%s3228_s2 + $0x20] sm:$0xff] }
  0xe2   : > { %v605_v43 = vpop.f32.mrf.mxu2 }
  0xe3   : > { %2289 = vmatmul.msk.bf16.vlgmr.msrb.gmra.mxu0 %vm242_vm0, %v1148_v40  ;;  %v609_v7 = vadd.f32 %v605_v43, %v575_v30  ;;  %v3052_v30 = vsel %vm2853_vm8, 0, %v1405_v0 }
  0xe4   : > { %v751_v59 = vpop.f32.mrf.mxu3  ;;  %1448 = vmatpush.bf16.msrb.mxu0 %v2473_v41  ;;  %v3063_v33 = vshrl.u32 %v3052_v30, 16  ;;  %v3066_v34 = vshll.u32 %v3052_v30, 16  ;;  %v1563_v55 = vrot.slane %v3052_v30, 1  ;;  %v1671_v41 = vrot.slane %v3078_v37, 2 }
  0xe5   : > { %v641_v45 = vadd.f32 %v637_v21, %v609_v7  ;;  %v3072_v21 = vshll.u32 %v3058_v32, 16 }
  0xe6   : > { %v693_v46 = vpop.f32.mrf.mxu1 }
  0xe7   : > { %v669_v50 = vadd.f32 %v665_v38, %v641_v45  ;;  %v1486_v38 = vrot.slane %v3066_v34, 1  ;;  %v1491_v7 = vrot.slane %v3072_v21, 1  ;;  %v1530_v45 = vrot.slane %v3078_v37, 1 }
  0xe8   : > { %v778_v60 = vpop.f32.mrf.mxu0 }
  0xe9   : > { %v697_v51 = vadd.f32 %v693_v46, %v669_v50  ;;  %v1487_v46 = vor.u32 %v1486_v38, %v3063_v33  ;;  %v1801_v38 = vrot.slane %v3069_v35, 2 }
  0xea   : > { %v607_v52 = vpop.f32.mrf.mxu2 }
  0xec   : > { %v753_v63 = vpop.f32.mrf.mxu3 }
  0xed   : > { %2310 = vmatmul.msk.bf16.vlgmr.msrb.gmra.mxu3 %vm242_vm0, %v1231_v49  ;;  %2351 = vmatmul.msk.bf16.vlgmr.msrb.gmra.mxu1 %vm242_vm0, %v3052_v30  ;;  %v1492_v49 = vsel %vm1481_vm14, %v1487_v46, %v1491_v7  ;;  %v1628_v63 = vrot.slane %v3063_v33, 1  ;;  %v2484_v46 = vld [vmem:[%s3228_s2 + $0x30] sm:$0xff] }
  0xee   : > { %v695_v23 = vpop.f32.mrf.mxu1  ;;  %1548 = vmatpush.bf16.msrb.mxu3 %v2475_v18  ;;  %v2481_v18 = vld [vmem:[%s3228_s2 + $0x58] sm:$0xff] }
  0xef   : > { %2331 = vmatmul.msk.bf16.vlgmr.msra.gmra.mxu2 %vm242_vm0, %v1316_v53  ;;  %v1596_v23 = vrot.slane %v3044_v28, 1  ;;  %1753 = vmatpush.bf16.msrb.mxu1 %v2481_v18 }
  0xf0   : > { %v780_v11 = vpop.f32.mrf.mxu0 }
  0xf1   : > { %v1666_v11 = vrot.slane %v3075_v8, 2 }
  0xf2   : > { %v722_v2 = vpop.f32.mrf.mxu2 }
  0xf3   : > { %2317 = vmatmul.msk.bf16.vlgmr.msra.gmra.mxu0 %vm242_vm0, %v1260_v39  ;;  %v726_v61 = vadd.f32 %v722_v2, %v697_v51  ;;  %v1526_v51 = vor.u32 %v1525_v44, %v3069_v35  ;;  %v1597_v39 = vrot.slane %v3048_v29, 1  ;;  %v1631_v2 = vshrl.u32 %v3058_v32, 16 }
  0xf4   : > { %v863_v5 = vpop.f32.mrf.mxu3  ;;  %1582 = vmatpush.bf16.msra.mxu0 %v2476_v19  ;;  %v1703_v19 = vrot.slane %v3052_v30, 2 }
  0xf5   : > { %v755_v56 = vadd.f32 %v751_v59, %v726_v61  ;;  %v1531_v52 = vsel %vm1481_vm14, %v1526_v51, %v1530_v45  ;;  %v1565_v59 = vsel %vm1562_vm15, %v1563_v55, %v1564_v6  ;;  %v2479_v61 = vld [vmem:[%s3228_s2 + $0x50] sm:$0xff]  ;;  %v1769_v0 = vrot.slane %v1631_v2, 2 }
  0xf6   : > { %v805_v3 = vpop.f32.mrf.mxu1  ;;  %v1705_v1 = vsel %vm1702_vm2, %v1703_v19, %v1704_v42  ;;  %v1869_v51 = vrot.slane %v3048_v29, 3 }
  0xf7   : > { %v782_v4 = vadd.f32 %v778_v60, %v755_v56  ;;  %v2478_v60 = vld [vmem:[%s3228_s2 + $0x18] sm:$0xff]  ;;  %v1629_v56 = vrot.slane %v3066_v34, 2 }
  0xf8   : > { %v890_v25 = vpop.f32.mrf.mxu0  ;;  %1653 = vmatpush.bf16.msra.mxu2 %v2478_v60 }
  0xf9   : > { %v809_v9 = vadd.f32 %v805_v3, %v782_v4  ;;  %v1598_v3 = vsel %vm1562_vm15, %v1596_v23, %v1597_v39  ;;  %v1633_v4 = vrot.slane %v1631_v2, 1 }
  0xfa   : > { %v724_v10 = vpop.f32.mrf.mxu2 }
  0xfb   : > { %v1630_v10 = vor.u32 %v1629_v56, %v1628_v63 }
  0xfc   : > { %v865_v40 = vpop.f32.mrf.mxu3 }
  0xfd   : > { %2338 = vmatmul.msk.bf16.vlgmr.msra.gmra.mxu3 %vm242_vm0, %v1343_v57  ;;  %v1665_v57 = vrot.slane %v3069_v35, 1  ;;  %2379 = vmatmul.msk.bf16.vlgmr.msra.gmra.mxu1 %vm242_vm0, %v1598_v3  ;;  %v1802_v40 = vrot.slane %v3075_v8, 3  ;;  %v2485_v35 = vld [vmem:[%s3228_s2 + $0x68] sm:$0xff]  ;;  %v1837_v8 = vrot.slane %v3052_v30, 3 }
  0xfe   : > { %v807_v12 = vpop.f32.mrf.mxu1  ;;  %1690 = vmatpush.bf16.msra.mxu3 %v2479_v61  ;;  %1887 = vmatpush.bf16.msra.mxu1 %v2485_v35 }
  0xff   : > { %2358 = vmatmul.msk.bf16.vlgmr.msrb.gmra.mxu2 %vm242_vm0, %v1492_v49  ;;  %v1668_v12 = vshrl.u32 %v3048_v29, 16  ;;  %v1667_v14 = vor.u32 %v1666_v11, %v1665_v57 }
 0x100   : > { %v892_v50 = vpop.f32.mrf.mxu0  ;;  %1789 = vmatpush.bf16.msrb.mxu2 %v2482_v58 }
 0x101   : > { %v1670_v15 = vrot.slane %v1668_v12, 1  ;;  %v1804_v7 = vrot.slane %v1668_v12, 2  ;;  %v1868_v50 = vrot.slane %v3044_v28, 3 }
 0x102   : > { %v834_v24 = vpop.f32.mrf.mxu2 }
 0x103   : > { %v838_v62 = vadd.f32 %v834_v24, %v809_v9  ;;  %2346 = vmatmul.msk.bf16.vlgmr.msrb.gmra.mxu0 %vm242_vm0, %v3044_v28  ;;  %v1634_v9 = vrot.slane %v3072_v21, 2  ;;  %v1672_v47 = vor.u32 %v1671_v41, %v1670_v15  ;;  %v2483_v24 = vld [vmem:[%s3228_s2 + $0x60] sm:$0xff] }
 0x104   : > { %1722 = vmatpush.bf16.msrb.mxu0 %v2480_v17 }
 0x105   : > { %v867_v27 = vadd.f32 %v863_v5, %v838_v62  ;;  %v1635_v13 = vor.u32 %v1634_v9, %v1633_v4  ;;  %v1673_v5 = vsel %vm1627_vm1, %v1667_v14, %v1672_v47  ;;  %v1767_v62 = vrot.slane %v3066_v34, 3 }
 0x106   : > { %v917_v31 = vpop.f32.mrf.mxu1  ;;  %v1803_v34 = vor.u32 %v1802_v40, %v1801_v38 }
 0x107   : > { %v894_v36 = vadd.f32 %v890_v25, %v867_v27  ;;  %v1636_v16 = vsel %vm1627_vm1, %v1630_v10, %v1635_v13  ;;  %v1766_v25 = vrot.slane %v3063_v33, 2  ;;  %v1770_v27 = vrot.slane %v3072_v21, 3 }
 0x108   : > { %v1805_v33 = vrot.slane %v3078_v37, 3  ;;  %v1838_v37 = vrot.slane %v3058_v32, 3 }
 0x109   : > { %v3081_v43 = vadd.f32 %v917_v31, %v894_v36  ;;  %v1768_v31 = vor.u32 %v1767_v62, %v1766_v25  ;;  %v1771_v36 = vor.u32 %v1770_v27, %v1769_v0  ;;  %v1367_v62 = vstv %s2242_s7 }
 0x10a   : > { %v836_v48 = vpop.f32.mrf.mxu2  ;;  %v1806_v45 = vor.u32 %v1805_v33, %v1804_v7 }
 0x10b   : > { %v1772_v44 = vsel %vm1765_vm3, %v1768_v31, %v1771_v36  ;;  %v1839_v48 = vsel %vm1836_vm4, %v1837_v8, %v1838_v37 }
 0x10c   : > { %v1807_v21 = vsel %vm1765_vm3, %v1803_v34, %v1806_v45 }
 0x10d   : > { %2365 = vmatmul.msk.bf16.vlgmr.msrb.gmra.mxu3 %vm242_vm0, %v1531_v52  ;;  %2407 = vmatmul.msk.bf16.vlgmr.msrb.gmra.mxu1 %vm242_vm0, %v1736_v26 }
 0x10e   : > { %v919_v53 = vpop.f32.mrf.mxu1  ;;  %1824 = vmatpush.bf16.msrb.mxu3 %v2483_v24 }
 0x10f   : > { %2386 = vmatmul.msk.bf16.vlgmr.msra.gmra.mxu2 %vm242_vm0, %v1636_v16  ;;  %v1870_v53 = vsel %vm1836_vm4, %v1868_v50, %v1869_v51 }
 0x113   : > { %2372 = vmatmul.msk.bf16.vlgmr.msra.gmra.mxu0 %vm242_vm0, %v1565_v59 }
 0x114   : > { %1856 = vmatpush.bf16.msra.mxu0 %v2484_v46 }
 0x11d   : > { %2393 = vmatmul.msk.bf16.vlgmr.msra.gmra.mxu3 %vm242_vm0, %v1673_v5  ;;  %2435 = vmatmul.msk.bf16.vlgmr.msra.gmra.mxu1 %vm242_vm0, %v1870_v53 }
 0x11f   : > { %2414 = vmatmul.msk.bf16.vlgmr.msrb.gmra.mxu2 %vm242_vm0, %v1772_v44 }
 0x123   : > { %2400 = vmatmul.msk.bf16.vlgmr.msrb.gmra.mxu0 %vm242_vm0, %v1705_v1 }
 0x12d   : > { %2421 = vmatmul.msk.bf16.vlgmr.msrb.gmra.mxu3 %vm242_vm0, %v1807_v21 }
 0x133   : > { %2428 = vmatmul.msk.bf16.vlgmr.msra.gmra.mxu0 %vm242_vm0, %v1839_v48 }
 0x13a   : > { %v997_v49 = vpop.f32.mrf.mxu2  ;;  %v1082_v52 = vpop.f32.mrf.mxu1 }
 0x142   : > { %v999_v55 = vpop.f32.mrf.mxu2  ;;  %v1084_v6 = vpop.f32.mrf.mxu1 }
 0x14a   : > { %v1196_v59 = vpop.f32.mrf.mxu1 }
 0x150   : > { %v1019_v30 = vpop.f32.mrf.mxu3  ;;  %v1050_v23 = vpop.f32.mrf.mxu0 }
 0x151   : > { %v1020_v2 = vadd.f32 %v1019_v30, %v997_v49 }
 0x152   : > { %v1110_v32 = vpop.f32.mrf.mxu2  ;;  %v1198_v39 = vpop.f32.mrf.mxu1 }
 0x153   : > { %v1054_v29 = vadd.f32 %v1050_v23, %v1020_v2 }
 0x155   : > { %v1086_v56 = vadd.f32 %v1082_v52, %v1054_v29 }
 0x157   : > { %v1114_v10 = vadd.f32 %v1110_v32, %v1086_v56 }
 0x158   : > { %v1021_v60 = vpop.f32.mrf.mxu3  ;;  %v1052_v61 = vpop.f32.mrf.mxu0 }
 0x15a   : > { %v1112_v28 = vpop.f32.mrf.mxu2  ;;  %v1308_v63 = vpop.f32.mrf.mxu1 }
 0x160   : > { %v1138_v3 = vpop.f32.mrf.mxu3  ;;  %v1167_v4 = vpop.f32.mrf.mxu0 }
 0x161   : > { %v1142_v11 = vadd.f32 %v1138_v3, %v1114_v10 }
 0x162   : > { %v1223_v9 = vpop.f32.mrf.mxu2  ;;  %v1310_v57 = vpop.f32.mrf.mxu1 }
 0x163   : > { %v1171_v13 = vadd.f32 %v1167_v4, %v1142_v11 }
 0x165   : > { %v1200_v15 = vadd.f32 %v1196_v59, %v1171_v13 }
 0x167   : > { %v1227_v5 = vadd.f32 %v1223_v9, %v1200_v15 }
 0x168   : > { %v1140_v12 = vpop.f32.mrf.mxu3  ;;  %v1169_v41 = vpop.f32.mrf.mxu0 }
 0x16a   : > { %v1225_v14 = vpop.f32.mrf.mxu2  ;;  %v1473_v38 = vpop.f32.mrf.mxu1 }
 0x170   : > { %v1250_v16 = vpop.f32.mrf.mxu3  ;;  %v1279_v47 = vpop.f32.mrf.mxu0 }
 0x171   : > { %v1254_v18 = vadd.f32 %v1250_v16, %v1227_v5 }
 0x172   : > { %v1335_v17 = vpop.f32.mrf.mxu2  ;;  %v1475_v44 = vpop.f32.mrf.mxu1 }
 0x173   : > { %v1283_v19 = vadd.f32 %v1279_v47, %v1254_v18 }
 0x175   : > { %v1312_v58 = vadd.f32 %v1308_v63, %v1283_v19  ;;  %v1999_v63 = vadd.s32 8, %v1943_v20 }
 0x177   : > { %v1339_v24 = vadd.f32 %v1335_v17, %v1312_v58 }
 0x178   : > { %v1252_v42 = vpop.f32.mrf.mxu3  ;;  %v1281_v1 = vpop.f32.mrf.mxu0 }
 0x17a   : > { %v1337_v22 = vpop.f32.mrf.mxu2  ;;  %v1617_v6 = vpop.f32.mrf.mxu1 }
 0x17b   : > { %v922_v22 = vstv %s2144_s8  ;;  %s2600_s8 = scalar_lea.hbm %s3231_s5, 128 }
 0x17c   : > { %p2602_p4 = scmp.lt.s32.totalorder %s2600_s8, %s2596_s30 }
 0x17e   : > { %p2603_p7 = por %p2602_p4, %p2601_p3 }
 0x180   : > { %v1362_v25 = vpop.f32.mrf.mxu3  ;;  %v1450_v31 = vpop.f32.mrf.mxu0  ;;  %p2604_p8 = pnand %p2603_p7, %p2599_p2 }
 0x181   : > { %v1366_v26 = vadd.f32 %v1362_v25, %v1339_v24  ;;  %v1474_v46 = vadd.f32 %v1473_v38, %v1450_v31  ;;  %v923_v25 = vadd.f32 %v922_v22, %v3081_v43 }
 0x182   : > { %v1511_v54 = vpop.f32.mrf.mxu2  ;;  %v1619_v3 = vpop.f32.mrf.mxu1 }
 0x183   : > { %v1368_v0 = vadd.f32 %v1367_v62, %v1366_v26  ;;  %v1516_v51 = vadd.f32 %v1511_v54, %v1474_v46 }
 0x185   : > { %v2339_v27 = vmul.f32 -1.442695, %v1368_v0 }
 0x187   : > { %2545 = vpow2.f32 %v2339_v27  ;;  %v2241_v27 = vmul.f32 -1.442695, %v923_v25 }
 0x188   : > { %v1364_v36 = vpop.f32.mrf.mxu3  ;;  %v1452_v33 = vpop.f32.mrf.mxu0 }
 0x189   : > { %v1476_v12 = vadd.f32 %v1475_v44, %v1452_v33  ;;  %v1896_v36 = vstv %s3153_s9 }
 0x18a   : > { %v1513_v52 = vpop.f32.mrf.mxu2  ;;  %v1755_v41 = vpop.f32.mrf.mxu1 }
 0x18b   : > { %v1517_v15 = vadd.f32 %v1513_v52, %v1476_v12 }
 0x18d   : > { %v2546_v40 = vpop.eup %2545 }
 0x18e   : > { %v1372_v7 = vadd.f32 1.0, %v2546_v40 }
 0x190   : > { %2547 = vrcp.f32 %v1372_v7  ;;  %v1550_v21 = vpop.f32.mrf.mxu3  ;;  %v1384_v8 = vand.u32 2147483648, %v1372_v7  ;;  %v1382_v48 = vand.u32 2147483647, %v1372_v7  ;;  %v1584_v50 = vpop.f32.mrf.mxu0  ;;  %vm1378_vm6 = vweird.f32 %v1372_v7 }
 0x191   : > { %v1555_v30 = vadd.f32 %v1550_v21, %v1516_v51  ;;  %2549 = vpow2.f32 %v2241_v27 }
 0x192   : > { %v1385_v53 = vor.u32 1.1754944e-38, %v1384_v8  ;;  %vm1383_vm8 = vcmp.eq.f32.partialorder %v1382_v48, 8.507059e+37  ;;  %v1655_v28 = vpop.f32.mrf.mxu2  ;;  %v1757_v19 = vpop.f32.mrf.mxu1 }
 0x193   : > { %v1589_v60 = vadd.f32 %v1584_v50, %v1555_v30 }
 0x195   : > { %v1622_v29 = vadd.f32 %v1617_v6, %v1589_v60 }
 0x196   : > { %v2548_v34 = vpop.eup %2547 }
 0x197   : > { %v1374_v45 = vmul.f32 %v2548_v34, %v1372_v7  ;;  %vm1379_vm5 = vweird.f32 %v2548_v34  ;;  %v1660_v9 = vadd.f32 %v1655_v28, %v1622_v29  ;;  %v2550_v54 = vpop.eup %2549 }
 0x198   : > { %vm1380_vm7 = vmor %vm1378_vm6, %vm1379_vm5  ;;  %v1552_v2 = vpop.f32.mrf.mxu3  ;;  %v1586_v61 = vpop.f32.mrf.mxu0 }
 0x199   : > { %v1375_v35 = vsub.f32 1.0, %v1374_v45  ;;  %v1556_v5 = vadd.f32 %v1552_v2, %v1517_v15  ;;  %v927_v45 = vadd.f32 1.0, %v2550_v54 }
 0x19a   : > { %v1657_v11 = vpop.f32.mrf.mxu2  ;;  %v1889_v0 = vpop.f32.mrf.mxu1 }
 0x19b   : > { %v1376_v37 = vmul.f32 %v2548_v34, %v1375_v35  ;;  %v1590_v42 = vadd.f32 %v1586_v61, %v1556_v5  ;;  %vm933_vm9 = vweird.f32 %v927_v45  ;;  %v937_v2 = vand.u32 2147483647, %v927_v45 }
 0x19d   : > { %v1377_v49 = vadd.f32 %v2548_v34, %v1376_v37  ;;  %v1623_v58 = vadd.f32 %v1619_v3, %v1590_v42  ;;  %vm938_vm12 = vcmp.eq.f32.partialorder %v937_v2, 8.507059e+37  ;;  %v2032_v2 = vld [vmem:[%s2738_s13 + $0x38] sm:$0xff] }
 0x19f   : > { %v1381_v55 = vsel %vm1380_vm7, %v2548_v34, %v1377_v49  ;;  %v1661_v26 = vadd.f32 %v1657_v11, %v1623_v58 }
 0x1a0   : > { %v1386_v59 = vsel %vm1383_vm8, %v1385_v53, %v1381_v55  ;;  %v1692_v4 = vpop.f32.mrf.mxu3  ;;  %v1724_v57 = vpop.f32.mrf.mxu0 }
 0x1a1   : > { %v1955_v23 = vperm.slane %v1386_v59, 2  ;;  %v1948_v32 = vperm.slane %v1386_v59, 1  ;;  %v1941_v39 = vperm.slane %v1386_v59, 0  ;;  %v1962_v56 = vperm.slane %v1386_v59, 3 }
 0x1a2   : > { %v1697_v10 = vadd.f32 %v1692_v4, %v1660_v9  ;;  %v1791_v17 = vpop.f32.mrf.mxu2  ;;  %v1891_v51 = vpop.f32.mrf.mxu1 }
 0x1a3   : > { %1960 = vperm.xlu0 %2541, %v1955_v23   ;;  %1953 = vperm.xlu2 %2540, %v1948_v32  }
 0x1a4   : > { %1946 = vperm.xlu1 %2539, %v1941_v39   ;;  %v1729_v13 = vadd.f32 %v1724_v57, %v1697_v10 }
 0x1a6   : > { %v1760_v16 = vadd.f32 %v1755_v41, %v1729_v13 }
 0x1a8   : > { %v1694_v14 = vpop.f32.mrf.mxu3  ;;  %v1726_v47 = vpop.f32.mrf.mxu0  ;;  %v1796_v18 = vadd.f32 %v1791_v17, %v1760_v16 }
 0x1a9   : > { %v1698_v38 = vadd.f32 %v1694_v14, %v1661_v26 }
 0x1aa   : > { %v1793_v34 = vpop.f32.mrf.mxu2 }
 0x1ab   : > { %1967 = vperm.xlu2 %2540, %v1962_v56   ;;  %2544 = vset.pattern.permute.xlu0 %v1999_v63  ;;  %v1730_v7 = vadd.f32 %v1726_v47, %v1698_v38 }
 0x1ac   : > { %2542 = vset.pattern.permute.xlu1 %v1999_v63 }
 0x1ad   : > { %v1761_v44 = vadd.f32 %v1757_v19, %v1730_v7 }
 0x1af   : > { %v1797_v21 = vadd.f32 %v1793_v34, %v1761_v44 }
 0x1b0   : > { %v1826_v1 = vpop.f32.mrf.mxu3  ;;  %v1858_v24 = vpop.f32.mrf.mxu0 }
 0x1b1   : > { %v1831_v20 = vadd.f32 %v1826_v1, %v1796_v18  ;;  %v2561_v18 = vld [vmem:[%s2738_s13 + $0x10] sm:$0xff] }
 0x1b3   : > { %2543 = vset.pattern.permute.xlu2 %v1999_v63  ;;  %v1863_v62 = vadd.f32 %v1858_v24, %v1831_v20 }
 0x1b4   : > { %2001 = vperm.xlu1 %2542, %v1941_v39  }
 0x1b5   : > { %v1894_v31 = vadd.f32 %v1889_v0, %v1863_v62  ;;  %v2562_v62 = vld [vmem:[%s2738_s13 + $0x30] sm:$0xff] }
 0x1b7   : > { %v1897_v40 = vadd.f32 %v1896_v36, %v1894_v31 }
 0x1b8   : > { %v1828_v46 = vpop.f32.mrf.mxu3  ;;  %v1860_v8 = vpop.f32.mrf.mxu0 }
 0x1b9   : > { %v2436_v33 = vmul.f32 -1.442695, %v1897_v40  ;;  %v1832_v35 = vadd.f32 %v1828_v46, %v1797_v21 }
 0x1bb   : > { %2007 = vperm.xlu2 %2543, %v1948_v32   ;;  %2551 = vpow2.f32 %v2436_v33  ;;  %v1864_v48 = vadd.f32 %v1860_v8, %v1832_v35  ;;  %v939_v32 = vand.u32 2147483648, %v927_v45 }
 0x1bc   : > { %2013 = vperm.xlu1 %2542, %v1955_v23   ;;  %2553 = vrcp.f32 %v927_v45 }
 0x1bd   : > { %v1895_v52 = vadd.f32 %v1891_v51, %v1864_v48  ;;  %v940_v61 = vor.u32 1.1754944e-38, %v939_v32  ;;  %v2030_v48 = vld [vmem:[%s2738_s13 + $0x18] sm:$0xff] }
 0x1bf   : > { %v1898_v53 = vadd.f32 %v1896_v36, %v1895_v52 }
 0x1c1   : > { %v2552_v43 = vpop.eup %2551  ;;  %v2437_v59 = vmul.f32 -1.442695, %v1898_v53  ;;  %v2563_v53 = vld [vmem:[%s2738_s13 + $0x20] sm:$0xff] }
 0x1c2   : > { %v1905_v37 = vadd.f32 1.0, %v2552_v43  ;;  %v2554_v50 = vpop.eup %2553 }
 0x1c3   : > { %2019 = vperm.xlu2 %2543, %v1962_v56   ;;  %v929_v49 = vmul.f32 %v2554_v50, %v927_v45  ;;  %vm934_vm10 = vweird.f32 %v2554_v50 }
 0x1c4   : > { %2555 = vrcp.f32 %v1905_v37  ;;  %vm935_vm11 = vmor %vm933_vm9, %vm934_vm10  ;;  %vm1912_vm13 = vweird.f32 %v1905_v37  ;;  %v1918_v3 = vand.u32 2147483648, %v1905_v37  ;;  %v1916_v9 = vand.u32 2147483647, %v1905_v37 }
 0x1c5   : > { %v930_v55 = vsub.f32 1.0, %v929_v49  ;;  %2557 = vpow2.f32 %v2437_v59  ;;  %v2564_v59 = vld [vmem:[%s2738_s13] sm:$0xff] }
 0x1c6   : > { %v1919_v11 = vor.u32 1.1754944e-38, %v1918_v3  ;;  %vm1917_vm1 = vcmp.eq.f32.partialorder %v1916_v9, 8.507059e+37 }
 0x1c7   : > { %v931_v30 = vmul.f32 %v2554_v50, %v930_v55 }
 0x1c9   : > { %v932_v39 = vadd.f32 %v2554_v50, %v931_v30 }
 0x1ca   : > { %v2556_v6 = vpop.eup %2555 }
 0x1cb   : > { %v1908_v23 = vmul.f32 %v2556_v6, %v1905_v37  ;;  %v936_v28 = vsel %vm935_vm11, %v2554_v50, %v932_v39  ;;  %v2558_v29 = vpop.eup %2557  ;;  %vm1913_vm14 = vweird.f32 %v2556_v6 }
 0x1cc   : > { %v3157_v56 = vsel %vm938_vm12, %v940_v61, %v936_v28  ;;  %v1906_v57 = vadd.f32 1.0, %v2558_v29  ;;  %vm1914_vm15 = vmor %vm1912_vm13, %vm1913_vm14 }
 0x1cd   : > { %v1909_v60 = vsub.f32 1.0, %v1908_v23  ;;  %v1938_v10 = vrot.slane %v3157_v56, 1  ;;  %v1940_v47 = vrot.slane %v3157_v56, 3  ;;  %v1939_v31 = vrot.slane %v3157_v56, 2 }
 0x1ce   : > { %2559 = vrcp.f32 %v1906_v57  ;;  %vm1927_vm2 = vweird.f32 %v1906_v57  ;;  %v1933_v27 = vand.u32 2147483648, %v1906_v57  ;;  %v1931_v38 = vand.u32 2147483647, %v1906_v57 }
 0x1cf   : > { %v1910_v63 = vmul.f32 %v2556_v6, %v1909_v60  ;;  %v1970_v41 = vperm.slane %v1938_v10, 0  ;;  %v1972_v42 = vperm.slane %v1940_v47, 0  ;;  %v1971_v7 = vperm.slane %v1939_v31, 0 }
 0x1d0   : > { %v1934_v40 = vor.u32 1.1754944e-38, %v1933_v27  ;;  %vm1932_vm5 = vcmp.eq.f32.partialorder %v1931_v38, 8.507059e+37  ;;  %v1969_v34 = vperm.slane %v3157_v56, 0  ;;  %v2029_v56 = vld [vmem:[%s2738_s13 + $0x8] sm:$0xff] }
 0x1d1   : > { %v1911_v4 = vadd.f32 %v2556_v6, %v1910_v63 }
 0x1d3   : > { %v1915_v12 = vsel %vm1914_vm15, %v2556_v6, %v1911_v4 }
 0x1d4   : > { %v1920_v14 = vsel %vm1917_vm1, %v1919_v11, %v1915_v12  ;;  %v2560_v5 = vpop.eup %2559  ;;  %v2031_v11 = vld [vmem:[%s2738_s13 + $0x28] sm:$0xff] }
 0x1d5   : > { %v1923_v1 = vmul.f32 %v2560_v5, %v1906_v57  ;;  %vm1928_vm3 = vweird.f32 %v2560_v5 }
 0x1d6   : > { %vm1929_vm4 = vmor %vm1927_vm2, %vm1928_vm3 }
 0x1d7   : > { %v1924_v24 = vsub.f32 1.0, %v1923_v1 }
 0x1d9   : > { %v1925_v0 = vmul.f32 %v2560_v5, %v1924_v24 }
 0x1db   : > { %v1926_v36 = vadd.f32 %v2560_v5, %v1925_v0 }
 0x1dd   : > { %v1930_v33 = vsel %vm1929_vm4, %v2560_v5, %v1926_v36 }
 0x1de   : > { %v1935_v43 = vsel %vm1932_vm5, %v1934_v40, %v1930_v33 }
 0x1fd   : > { %v1954_v13 = vpop.permute.xlu2 %1953 }
 0x1fe   : > { %v1978_v15 = vadd.f32 %v1970_v41, %v1954_v13 }
 0x200   : > { %v1982_v16 = vadd.f32 %v1978_v15, %v1920_v14 }
 0x202   : > { %v1986_v17 = vmul.f32 0.33333334, %v1982_v16 }
 0x204   : > { %v1990_v19 = vmul.f32 %v2561_v18, %v1986_v17 }
 0x205   : > { %v1968_v20 = vpop.permute.xlu2 %1967 }
 0x206   : > { %1994 = vst.msk [vmem:[%s3165_s12 + $0x10] sm:$0xff] %vm242_vm0, %v1990_v19  ;;  %v1980_v22 = vadd.f32 %v1972_v42, %v1968_v20 }
 0x208   : > { %v1984_v58 = vadd.f32 %v1980_v22, %v1920_v14 }
 0x20a   : > { %v1988_v25 = vmul.f32 0.33333334, %v1984_v58 }
 0x20c   : > { %v1992_v26 = vmul.f32 %v2562_v62, %v1988_v25 }
 0x20e   : > { %1996 = vst.msk [vmem:[%s3165_s12 + $0x30] sm:$0xff] %vm242_vm0, %v1992_v26 }
 0x215   : > { %v1961_v54 = vpop.permute.xlu0 %1960  ;;  %v2008_v44 = vpop.permute.xlu2 %2007 }
 0x216   : > { %v1979_v45 = vadd.f32 %v1971_v7, %v1961_v54  ;;  %v2022_v21 = vadd.f32 %v2008_v44, %v1970_v41  ;;  %v1947_v46 = vpop.permute.xlu1 %1946 }
 0x217   : > { %v1977_v35 = vadd.f32 %v1969_v34, %v1947_v46 }
 0x218   : > { %v1983_v8 = vadd.f32 %v1979_v45, %v1920_v14  ;;  %v2026_v37 = vadd.f32 %v2022_v21, %v1935_v43 }
 0x219   : > { %v1981_v50 = vadd.f32 %v1977_v35, %v1920_v14 }
 0x21a   : > { %v1987_v51 = vmul.f32 0.33333334, %v1983_v8  ;;  %v2034_v49 = vmul.f32 0.33333334, %v2026_v37 }
 0x21b   : > { %v1985_v52 = vmul.f32 0.33333334, %v1981_v50 }
 0x21c   : > { %v1991_v55 = vmul.f32 %v2563_v53, %v1987_v51  ;;  %v2038_v6 = vmul.f32 %v2034_v49, %v2030_v48 }
 0x21d   : > { %v1989_v30 = vmul.f32 %v2564_v59, %v1985_v52  ;;  %v2020_v23 = vpop.permute.xlu2 %2019 }
 0x21e   : > { %1995 = vst.msk [vmem:[%s3165_s12 + $0x20] sm:$0xff] %vm242_vm0, %v1991_v55  ;;  %v2024_v32 = vadd.f32 %v2020_v23, %v1972_v42 }
 0x21f   : > { %2042 = vst.msk [vmem:[%s3165_s12 + $0x18] sm:$0xff] %vm242_vm0, %v2038_v6 }
 0x220   : > { %1993 = vst.msk [vmem:[%s3165_s12] sm:$0xff] %vm242_vm0, %v1989_v30  ;;  %v2028_v39 = vadd.f32 %v2024_v32, %v1935_v43 }
 0x222   : > { %v2036_v60 = vmul.f32 0.33333334, %v2028_v39 }
 0x224   : > { %v2040_v61 = vmul.f32 %v2036_v60, %v2032_v2 }
 0x226   : > { %2044 = vst.msk [vmem:[%s3165_s12 + $0x38] sm:$0xff] %vm242_vm0, %v2040_v61  ;;  %v2002_v28 = vpop.permute.xlu1 %2001 }
 0x227   : > { %v2021_v63 = vadd.f32 %v2002_v28, %v1969_v34 }
 0x229   : > { %v2025_v29 = vadd.f32 %v2021_v63, %v1935_v43 }
 0x22b   : > { %v2033_v3 = vmul.f32 0.33333334, %v2025_v29 }
 0x22d   : > { %v2037_v4 = vmul.f32 %v2033_v3, %v2029_v56 }
 0x22e   : > { %v2014_v9 = vpop.permute.xlu1 %2013 }
 0x22f   : > { %2041 = vst.msk [vmem:[%s3165_s12 + $0x8] sm:$0xff] %vm242_vm0, %v2037_v4  ;;  %v2023_v57 = vadd.f32 %v2014_v9, %v1971_v7 }
 0x231   : > { %v2027_v10 = vadd.f32 %v2023_v57, %v1935_v43 }
 0x233   : > { %v2035_v12 = vmul.f32 0.33333334, %v2027_v10 }
 0x235   : > { %v2039_v41 = vmul.f32 %v2035_v12, %v2031_v11 }
 0x237   : > { %2043 = vst.msk [vmem:[%s3165_s12 + $0x28] sm:$0xff] %vm242_vm0, %v2039_v41 }
 0x238   : > { %2607 = shalt.err (!%p2604_p8)
}
 0x239   : > { %s2649_s10 = smov 128   ;;  %s2650_s11 = smov 8  }
 0x23a   : > { %2491 = dma.vmem_to_hbm [thread:$0]  (%p2719_p5), %s2059_s23, 1024, %s2061_s25, %s2046_s22, %s2649_s10, %s2649_s10, %s2650_s11  }
 0x23b PF: > { %p2503_p9 = scmp.ge.s32.totalorder %s2646_s21, 2  ;;  %s2075_s12 = sand.u32 1, %s2634_s18  }
 0x23c   : > { %s2076_s14 = scalar_lea.sflag [#allocation3], %s2075_s12 }
 0x23d   : > { %p2498_p10 = pnand %p2503_p9, %p2723_p6 }
 0x23f   : > { %p2499_p11 = pneg %p2498_p10 }
 0x241   : > { %2629 = dma.done.wait (%p2499_p11), %s2076_s14, 1024  }
 0x242   : > { %2631 = vsyncadd (%p2499_p11), %s2076_s14, 4294966272  ;;  %p16_p12 = scmp.ge.s32.totalorder %s2706_s24, 4   ;;  %s3238_s18 = smov %s2638_s19 }
 0x243   : > { %s3239_s19 = smov %s2642_s20  ;;  %s3240_s20 = smov %s2717_s27 }
 0x244   : > { %s3241_s21 = smov %s2706_s24  ;;  %18 = sbr.rel (!%p16_p12) target bundleno = 4 (0x4), region = 119 }
 0x249   :  { %2082 = vsyncpa [#allocation3], 1 }
 0x24a   :  { %2084 = vsyncpa [#allocation3 + $0x1], 1 }
 0x24b   :  { %2085 = vsyncpa [#allocation4], 1 }
 0x24c   :  { %2087 = vsyncpa [#allocation4 + $0x1], 1 }

</bundles_post_ra>
